<compile_context>
chip_gen: v7x
topology: tpu7x:2x2x1
jax: 0.10.0
libtpu: 0.0.40
codegen_flags: <defaults>
</compile_context>

<pallas_src>
import functools

import numpy as np
import jax
import jax.numpy as jnp
from jax import lax
from jax.experimental import pallas as pl
from jax.experimental.pallas import tpu as pltpu


# MXU operand dtype for the conv matmuls.  bf16 gives 2-3x MXU throughput on
# v5e/v6e/v7x (accumulation stays f32 via preferred_element_type), but activation
# bits lost in bf16 compound across layers through the BN normalization, so f32
# (well inside the 2e-3 gate vs the f32 PyTorch reference) is the default here.
MXU_CONV_DTYPE = jnp.float32
BN_EPS = 1e-5


def init_dense_block_params(key, inf, growth_factor, num_layers):
    """Deterministic params in PyTorch layouts (Conv2d weight = (Cout, Cin, 3, 3))."""
    params = []
    for i in range(num_layers):
        cin = inf + i * growth_factor
        cout = growth_factor
        key, kw, kb, kg, kbeta = jax.random.split(key, 5)
        fan_in = cin * 3 * 3
        bound = 1.0 / float(np.sqrt(fan_in))
        w = jax.random.uniform(kw, (cout, cin, 3, 3), jnp.float32, -bound, bound)
        b = jax.random.uniform(kb, (cout,), jnp.float32, -bound, bound)
        gamma = 1.0 + 0.1 * jax.random.normal(kg, (cout,), jnp.float32)
        beta = 0.1 * jax.random.normal(kbeta, (cout,), jnp.float32)
        params.append({"w": w, "b": b, "gamma": gamma, "beta": beta})
    return params


def pack_dense_block_params(params, inf, growth_factor, num_layers, height, width):
    """One-time host-side (numpy) preprocessing — hoists all per-forward layout work.

    Lane layout of the feature buffer is channel-major: lane = chan_slot*W + w.
    Channel slots: [0,c0) = block input, [c0,c0_pad) = alignment dummies (zero),
    then one g-wide slab per layer, appended in order.  Layer i's 3x3 conv becomes
    three matmuls (one per kernel row dh) with per-layer K-trimmed block-Toeplitz
    RHS of shape ((c0_pad + i*g)*W, g*W); out-of-range column taps simply have no
    weight (that is the spatial zero padding along W).
    """
    c0, g, nl, h, w = inf, growth_factor, num_layers, height, width
    gw = g * w

    # Pad the block-input channel slab so every layer's input prefix / output
    # store offset is a multiple of 128 lanes (exact here: g*w == 128).
    if 128 % w == 0:
        cpl = 128 // w
        c0_pad = ((c0 + cpl - 1) // cpl) * cpl
    else:
        c0_pad = c0        # graceful fallback: still correct, stores just unaligned

    def lane_chan(c):      # concat channel index -> channel slot in the lane layout
        return c if c < c0 else c0_pad + (c - c0)

    rhs = []
    bgb = np.zeros((nl, 3, gw), np.float32)
    for i, p in enumerate(params):
        cin = c0 + i * g                       # real input channels of layer i
        k = (c0_pad + i * g) * w               # lane width of the live input prefix
        w_oihw = np.asarray(p["w"], np.float32)          # (g, cin, 3, 3)
        r = np.zeros((3, k, gw), np.float32)
        for dh in range(3):
            for dw in range(3):
                for wo in range(w):
                    wi = wo + dw - 1
                    if not (0 <= wi < w):
                        continue               # spatial zero padding along W
                    for c in range(cin):
                        # output lanes co*w + wo for all co  <=>  slice wo::w
                        r[dh, lane_chan(c) * w + wi, wo::w] = w_oihw[:, c, dh, dw]
        rhs.append(jnp.asarray(r, MXU_CONV_DTYPE))
        bgb[i, 0] = np.repeat(np.asarray(p["b"], np.float32), w)
        bgb[i, 1] = np.repeat(np.asarray(p["gamma"], np.float32), w)
        bgb[i, 2] = np.repeat(np.asarray(p["beta"], np.float32), w)

    # Per-channel "sum over the W lanes of each channel block and rebroadcast".
    p_mat = np.kron(np.eye(g, dtype=np.float32), np.ones((w, w), np.float32))

    return {
        "rhs": tuple(rhs),                     # per-layer (3, k_i, g*W), trimmed K
        "bgb": jnp.asarray(bgb),               # (nl, 3, g*W) tiled bias/gamma/beta
        "p_mat": jnp.asarray(p_mat),           # (g*W, g*W)
        "meta": (c0, c0_pad, g, nl, h, w),
    }


@functools.partial(jax.jit, static_argnames=("meta",))
def _dense_block_forward_impl(x_nchw, rhs, bgb, p_mat, *, meta):
    c0, c0_pad, g, nl, h, w = meta
    n = x_nchw.shape[0]
    gw = g * w
    c_tot_pad = c0_pad + nl * g
    lanes = c_tot_pad * w
    rows = n * (h + 2)                          # 2 zero pad rows per image
    rows_pad = ((rows + 7) // 8) * 8            # sublane-tile aligned
    inv_m = 1.0 / float(n * h * w)

    # --- wrapper-side layout prep (shape-static, cheap / constant-folded) ---
    # Block input in channel-major lanes (lane = c*W + w) with zero spatial pad
    # rows already inserted and lanes padded to the aligned input slab width.
    x_rows = jnp.transpose(x_nchw.astype(jnp.float32), (0, 2, 1, 3)).reshape(n, h, c0 * w)
    x_rows = jnp.pad(x_rows, ((0, 0), (1, 1), (0, (c0_pad - c0) * w)))
    x2d = jnp.pad(x_rows.reshape(rows, c0_pad * w), ((0, rows_pad - rows), (0, 0)))

    # 0/1 mask of real (interior) image rows, pre-broadcast to the layer width.
    ridx = jnp.arange(rows_pad)
    rin = ridx % (h + 2)
    interior = (ridx < rows) & (rin >= 1) & (rin <= h)
    mask2d = jnp.broadcast_to(interior.astype(jnp.float32)[:, None], (rows_pad, gw))

    def kernel(x_ref, mask_ref, p_ref, bgb_ref, *rest):
        rhs_refs = rest[:nl]
        out_ref = rest[nl]
        # out_ref (rows_pad, lanes) doubles as the growing concat feature buffer:
        # no memset, no scratch, no final copy.  Pad rows of the input slab are
        # zero from the wrapper; pad rows of every layer slab are zeroed by the
        # row mask at store time; column padding is folded into the weights.
        out_ref[:, 0:c0_pad * w] = x_ref[...]
        mask = mask_ref[...]                               # (rows_pad, g*W)
        p_sum = p_ref[...]                                 # (g*W, g*W)

        for i in range(nl):                                # nl static & small: unrolled
            k = (c0_pad + i * g) * w                       # live input lane prefix
            off = k                                        # this layer's output slab
            lhs = out_ref[:, 0:k].astype(MXU_CONV_DTYPE)   # hoisted LHS, one load

            # 3x3 conv = 3 back-to-back row-tap matmuls (block-Toeplitz RHS),
            # f32 accumulation on the MXU.
            d0 = jnp.dot(lhs, rhs_refs[i][0], preferred_element_type=jnp.float32)
            d1 = jnp.dot(lhs, rhs_refs[i][1], preferred_element_type=jnp.float32)
            d2 = jnp.dot(lhs, rhs_refs[i][2], preferred_element_type=jnp.float32)
            # +/-1 image-row alignment on the narrow (rows,128) results via the
            # XLU; the zero pad row of each image kills the wrap-around terms.
            acc = (pltpu.roll(d0, shift=1, axis=0) + d1
                   + pltpu.roll(d2, shift=rows_pad - 1, axis=0))

            bgb_i = bgb_ref[i]                             # (3, g*W): bias/gamma/beta
            y = jnp.maximum(acc + bgb_i[0:1, :], 0.0)      # conv bias + ReLU

            # BatchNorm2d, training mode: biased batch stats over (N, H, W),
            # two-pass for numerical robustness, pad rows excluded via the mask;
            # per-channel reduce over W lanes + rebroadcast = one tiny matmul.
            ym = y * mask
            mean = inv_m * jnp.dot(jnp.sum(ym, axis=0, keepdims=True), p_sum,
                                   preferred_element_type=jnp.float32)
            yc = (y - mean) * mask
            var = inv_m * jnp.dot(jnp.sum(yc * yc, axis=0, keepdims=True), p_sum,
                                  preferred_element_type=jnp.float32)
            scale = bgb_i[1:2, :] * lax.rsqrt(var + BN_EPS)
            shift = bgb_i[2:3, :] - mean * scale

            # Direct contiguous 128-lane aligned store into this layer's channel
            # slab; the mask keeps its pad rows zero for the next layer's taps.
            out_ref[:, off:off + gw] = (y * scale + shift) * mask

    vmem = pl.BlockSpec(memory_space=pltpu.MemorySpace.VMEM)
    # TODO(synk): for non-toy N/H (or real DenseNet widths) add a row-tile grid
    # with dimension_semantics=("parallel", ...) + accumulator-based BN stats and
    # BlockSpec pipelining of x/out, so both v7x TensorCores are used and the
    # working set respects v7x's 64 MiB VMEM; at CIFAR scale one gridless call
    # (<1 MiB resident) is fastest.
    out2d = pl.pallas_call(
        kernel,
        out_shape=jax.ShapeDtypeStruct((rows_pad, lanes), jnp.float32),
        in_specs=[vmem] * (4 + nl),
        out_specs=vmem,
    )(x2d, mask2d, p_mat, bgb, *rhs)

    # Strip pad rows / dummy channels and return NCHW (all cheap XLA slices).
    feat = out2d[:rows].reshape(n, h + 2, c_tot_pad, w)[:, 1:h + 1]
    feat = jnp.transpose(feat, (0, 2, 1, 3))               # (n, c_tot_pad, h, w)
    if c0_pad != c0:
        feat = jnp.concatenate([feat[:, :c0], feat[:, c0_pad:]], axis=1)
    return feat


def dense_block_forward(x_nchw, packed):
    """DenseBlock forward.  x_nchw: (N, C, H, W) -> (N, C + L*growth, H, W)."""
    return _dense_block_forward_impl(
        x_nchw, packed["rhs"], packed["bgb"], packed["p_mat"], meta=packed["meta"])


def _reference_forward(x_nchw, params):
    """Pure-JAX reference (same math as the PyTorch module, training-mode BN)."""
    x = x_nchw.astype(jnp.float32)
    features = [x]
    for p in params:
        inp = jnp.concatenate(features, axis=1)
        y = lax.conv_general_dilated(
            inp, p["w"], window_strides=(1, 1), padding=((1, 1), (1, 1)),
            dimension_numbers=("NCHW", "OIHW", "NCHW"))
        y = y + p["b"][None, :, None, None]
        y = jnp.maximum(y, 0.0)
        mean = jnp.mean(y, axis=(0, 2, 3), keepdims=True)
        var = jnp.mean((y - mean) ** 2, axis=(0, 2, 3), keepdims=True)
        y = (y - mean) * lax.rsqrt(var + BN_EPS)
        y = y * p["gamma"][None, :, None, None] + p["beta"][None, :, None, None]
        features.append(y)
    return jnp.concatenate(features, axis=1)


if __name__ == "__main__":
    # Small shapes consistent with the module: CIFAR-ish NCHW input.
    N, C, H, W = 2, 4, 16, 16
    growth_factor = 8
    num_layers = 2

    key = jax.random.PRNGKey(0)
    key, kx = jax.random.split(key)
    x = jax.random.normal(kx, (N, C, H, W), jnp.float32)

    params = init_dense_block_params(key, C, growth_factor, num_layers)
    packed = pack_dense_block_params(params, C, growth_factor, num_layers, H, W)

    out = jax.block_until_ready(dense_block_forward(x, packed))
    assert out.shape == (N, C + num_layers * growth_factor, H, W), out.shape

    ref = jax.block_until_ready(_reference_forward(x, params))
    max_err = float(jnp.max(jnp.abs(out - ref)))
    if max_err > 2e-3:
        raise AssertionError(f"mismatch vs reference: max_err={max_err}")

    print("KERNEL_OK")
</pallas_src>

<mosaic_0001>
module attributes {stable_mosaic.version = 11 : i64} {
  func.func @kernel(%arg0: memref<40x128xf32, #tpu.memory_space<vmem>>, %arg1: memref<40x128xf32, #tpu.memory_space<vmem>>, %arg2: memref<128x128xf32, #tpu.memory_space<vmem>>, %arg3: memref<2x3x128xf32, #tpu.memory_space<vmem>>, %arg4: memref<3x128x128xf32, #tpu.memory_space<vmem>>, %arg5: memref<3x256x128xf32, #tpu.memory_space<vmem>>, %arg6: memref<40x384xf32, #tpu.memory_space<vmem>>) attributes {dimension_semantics = [], scalar_prefetch = 0 : i64, scratch_operands = 0 : i64, tpu.core_type = #tpu.core_type<tc>} {
    %c0 = arith.constant 0 : index
    %c0_0 = arith.constant 0 : index
    %0 = vector.load %arg0[%c0, %c0_0] : memref<40x128xf32, #tpu.memory_space<vmem>>, vector<40x128xf32>
    %c0_1 = arith.constant 0 : index
    %c0_2 = arith.constant 0 : index
    %1 = vector.load %arg6[%c0_1, %c0_2] : memref<40x384xf32, #tpu.memory_space<vmem>>, vector<40x128xf32>
    tpu.vector_store %arg6[%c0_1, %c0_2], %0 {strides = array<i32>} : memref<40x384xf32, #tpu.memory_space<vmem>>, vector<40x128xf32>,
    %c0_3 = arith.constant 0 : index
    %c0_4 = arith.constant 0 : index
    %2 = vector.load %arg1[%c0_3, %c0_4] : memref<40x128xf32, #tpu.memory_space<vmem>>, vector<40x128xf32>
    %c0_5 = arith.constant 0 : index
    %c0_6 = arith.constant 0 : index
    %3 = vector.load %arg2[%c0_5, %c0_6] : memref<128x128xf32, #tpu.memory_space<vmem>>, vector<128x128xf32>
    %c0_7 = arith.constant 0 : index
    %c0_8 = arith.constant 0 : index
    %4 = vector.load %arg6[%c0_7, %c0_8] : memref<40x384xf32, #tpu.memory_space<vmem>>, vector<40x128xf32>
    %c0_9 = arith.constant 0 : index
    %c0_10 = arith.constant 0 : index
    %c0_11 = arith.constant 0 : index
    %5 = vector.load %arg4[%c0_9, %c0_10, %c0_11] : memref<3x128x128xf32, #tpu.memory_space<vmem>>, vector<1x128x128xf32>
    %6 = vector.shape_cast %5 : vector<1x128x128xf32> to vector<128x128xf32>
    %cst = arith.constant dense<0.000000e+00> : vector<40x128xf32>
    %7 = tpu.matmul %4, %6, %cst {dimension_numbers = #tpu.dot_dimension_numbers<[1], [0], [0], [1], [0, 0, 1, 1], [], []>} : vector<40x128xf32>, vector<128x128xf32>, vector<40x128xf32> -> vector<40x128xf32>
    %c1 = arith.constant 1 : index
    %c0_12 = arith.constant 0 : index
    %c0_13 = arith.constant 0 : index
    %8 = vector.load %arg4[%c1, %c0_12, %c0_13] : memref<3x128x128xf32, #tpu.memory_space<vmem>>, vector<1x128x128xf32>
    %9 = vector.shape_cast %8 : vector<1x128x128xf32> to vector<128x128xf32>
    %cst_14 = arith.constant dense<0.000000e+00> : vector<40x128xf32>
    %10 = tpu.matmul %4, %9, %cst_14 {dimension_numbers = #tpu.dot_dimension_numbers<[1], [0], [0], [1], [0, 0, 1, 1], [], []>} : vector<40x128xf32>, vector<128x128xf32>, vector<40x128xf32> -> vector<40x128xf32>
    %c2 = arith.constant 2 : index
    %c0_15 = arith.constant 0 : index
    %c0_16 = arith.constant 0 : index
    %11 = vector.load %arg4[%c2, %c0_15, %c0_16] : memref<3x128x128xf32, #tpu.memory_space<vmem>>, vector<1x128x128xf32>
    %12 = vector.shape_cast %11 : vector<1x128x128xf32> to vector<128x128xf32>
    %cst_17 = arith.constant dense<0.000000e+00> : vector<40x128xf32>
    %13 = tpu.matmul %4, %12, %cst_17 {dimension_numbers = #tpu.dot_dimension_numbers<[1], [0], [0], [1], [0, 0, 1, 1], [], []>} : vector<40x128xf32>, vector<128x128xf32>, vector<40x128xf32> -> vector<40x128xf32>
    %c1_i32 = arith.constant 1 : i32
    %14 = tpu.dynamic_rotate %7 by %c1_i32 dim 0 : vector<40x128xf32>, i32 -> vector<40x128xf32>
    %15 = arith.addf %14, %10 : vector<40x128xf32>
    %c39_i32 = arith.constant 39 : i32
    %16 = tpu.dynamic_rotate %13 by %c39_i32 dim 0 : vector<40x128xf32>, i32 -> vector<40x128xf32>
    %17 = arith.addf %15, %16 : vector<40x128xf32>
    %c0_18 = arith.constant 0 : index
    %c0_19 = arith.constant 0 : index
    %c0_20 = arith.constant 0 : index
    %18 = vector.load %arg3[%c0_18, %c0_19, %c0_20] : memref<2x3x128xf32, #tpu.memory_space<vmem>>, vector<1x3x128xf32>
    %19 = vector.shape_cast %18 : vector<1x3x128xf32> to vector<3x128xf32>
    %20 = vector.extract_strided_slice %19 {offsets = [0, 0], sizes = [1, 128], strides = [1, 1]} : vector<3x128xf32> to vector<1x128xf32>
    %21 = vector.broadcast %20 : vector<1x128xf32> to vector<40x128xf32>
    %22 = arith.addf %17, %21 : vector<40x128xf32>
    %cst_21 = arith.constant 0.000000e+00 : f32
    %23 = vector.broadcast %cst_21 : f32 to vector<40x128xf32>
    %24 = arith.maximumf %22, %23 : vector<40x128xf32>
    %25 = arith.mulf %24, %2 : vector<40x128xf32>
    %cst_22 = arith.constant dense<0.000000e+00> : vector<128xf32>
    %26 = vector.multi_reduction <add>, %25, %cst_22 [0] : vector<40x128xf32> to vector<128xf32>
    %27 = vector.shape_cast %26 : vector<128xf32> to vector<1x128xf32>
    %cst_23 = arith.constant dense<0.000000e+00> : vector<1x128xf32>
    %28 = tpu.matmul %27, %3, %cst_23 {dimension_numbers = #tpu.dot_dimension_numbers<[1], [0], [0], [1], [0, 0, 1, 1], [], []>} : vector<1x128xf32>, vector<128x128xf32>, vector<1x128xf32> -> vector<1x128xf32>
    %cst_24 = arith.constant 0.001953125 : f32
    %29 = vector.broadcast %cst_24 : f32 to vector<1x128xf32>
    %30 = arith.mulf %29, %28 : vector<1x128xf32>
    %31 = vector.broadcast %30 : vector<1x128xf32> to vector<40x128xf32>
    %32 = arith.subf %24, %31 : vector<40x128xf32>
    %33 = arith.mulf %32, %2 : vector<40x128xf32>
    %34 = arith.mulf %33, %33 : vector<40x128xf32>
    %cst_25 = arith.constant dense<0.000000e+00> : vector<128xf32>
    %35 = vector.multi_reduction <add>, %34, %cst_25 [0] : vector<40x128xf32> to vector<128xf32>
    %36 = vector.shape_cast %35 : vector<128xf32> to vector<1x128xf32>
    %cst_26 = arith.constant dense<0.000000e+00> : vector<1x128xf32>
    %37 = tpu.matmul %36, %3, %cst_26 {dimension_numbers = #tpu.dot_dimension_numbers<[1], [0], [0], [1], [0, 0, 1, 1], [], []>} : vector<1x128xf32>, vector<128x128xf32>, vector<1x128xf32> -> vector<1x128xf32>
    %cst_27 = arith.constant 0.001953125 : f32
    %38 = vector.broadcast %cst_27 : f32 to vector<1x128xf32>
    %39 = arith.mulf %38, %37 : vector<1x128xf32>
    %40 = vector.extract_strided_slice %19 {offsets = [1, 0], sizes = [1, 128], strides = [1, 1]} : vector<3x128xf32> to vector<1x128xf32>
    %cst_28 = arith.constant 9.99999974E-6 : f32
    %41 = vector.broadcast %cst_28 : f32 to vector<1x128xf32>
    %42 = arith.addf %39, %41 : vector<1x128xf32>
    %43 = math.rsqrt %42 : vector<1x128xf32>
    %44 = arith.mulf %40, %43 : vector<1x128xf32>
    %45 = vector.extract_strided_slice %19 {offsets = [2, 0], sizes = [1, 128], strides = [1, 1]} : vector<3x128xf32> to vector<1x128xf32>
    %46 = arith.mulf %30, %44 : vector<1x128xf32>
    %47 = arith.subf %45, %46 : vector<1x128xf32>
    %48 = vector.broadcast %44 : vector<1x128xf32> to vector<40x128xf32>
    %49 = arith.mulf %24, %48 : vector<40x128xf32>
    %50 = vector.broadcast %47 : vector<1x128xf32> to vector<40x128xf32>
    %51 = arith.addf %49, %50 : vector<40x128xf32>
    %52 = arith.mulf %51, %2 : vector<40x128xf32>
    %c0_29 = arith.constant 0 : index
    %c128 = arith.constant 128 : index
    %53 = vector.load %arg6[%c0_29, %c128] : memref<40x384xf32, #tpu.memory_space<vmem>>, vector<40x128xf32>
    tpu.vector_store %arg6[%c0_29, %c128], %52 {strides = array<i32>} : memref<40x384xf32, #tpu.memory_space<vmem>>, vector<40x128xf32>,
    %c0_30 = arith.constant 0 : index
    %c0_31 = arith.constant 0 : index
    %54 = vector.load %arg6[%c0_30, %c0_31] : memref<40x384xf32, #tpu.memory_space<vmem>>, vector<40x256xf32>
    %c0_32 = arith.constant 0 : index
    %c0_33 = arith.constant 0 : index
    %c0_34 = arith.constant 0 : index
    %55 = vector.load %arg5[%c0_32, %c0_33, %c0_34] : memref<3x256x128xf32, #tpu.memory_space<vmem>>, vector<1x256x128xf32>
    %56 = vector.shape_cast %55 : vector<1x256x128xf32> to vector<256x128xf32>
    %cst_35 = arith.constant dense<0.000000e+00> : vector<40x128xf32>
    %57 = tpu.matmul %54, %56, %cst_35 {dimension_numbers = #tpu.dot_dimension_numbers<[1], [0], [0], [1], [0, 0, 1, 1], [], []>} : vector<40x256xf32>, vector<256x128xf32>, vector<40x128xf32> -> vector<40x128xf32>
    %c1_36 = arith.constant 1 : index
    %c0_37 = arith.constant 0 : index
    %c0_38 = arith.constant 0 : index
    %58 = vector.load %arg5[%c1_36, %c0_37, %c0_38] : memref<3x256x128xf32, #tpu.memory_space<vmem>>, vector<1x256x128xf32>
    %59 = vector.shape_cast %58 : vector<1x256x128xf32> to vector<256x128xf32>
    %cst_39 = arith.constant dense<0.000000e+00> : vector<40x128xf32>
    %60 = tpu.matmul %54, %59, %cst_39 {dimension_numbers = #tpu.dot_dimension_numbers<[1], [0], [0], [1], [0, 0, 1, 1], [], []>} : vector<40x256xf32>, vector<256x128xf32>, vector<40x128xf32> -> vector<40x128xf32>
    %c2_40 = arith.constant 2 : index
    %c0_41 = arith.constant 0 : index
    %c0_42 = arith.constant 0 : index
    %61 = vector.load %arg5[%c2_40, %c0_41, %c0_42] : memref<3x256x128xf32, #tpu.memory_space<vmem>>, vector<1x256x128xf32>
    %62 = vector.shape_cast %61 : vector<1x256x128xf32> to vector<256x128xf32>
    %cst_43 = arith.constant dense<0.000000e+00> : vector<40x128xf32>
    %63 = tpu.matmul %54, %62, %cst_43 {dimension_numbers = #tpu.dot_dimension_numbers<[1], [0], [0], [1], [0, 0, 1, 1], [], []>} : vector<40x256xf32>, vector<256x128xf32>, vector<40x128xf32> -> vector<40x128xf32>
    %c1_i32_44 = arith.constant 1 : i32
    %64 = tpu.dynamic_rotate %57 by %c1_i32_44 dim 0 : vector<40x128xf32>, i32 -> vector<40x128xf32>
    %65 = arith.addf %64, %60 : vector<40x128xf32>
    %c39_i32_45 = arith.constant 39 : i32
    %66 = tpu.dynamic_rotate %63 by %c39_i32_45 dim 0 : vector<40x128xf32>, i32 -> vector<40x128xf32>
    %67 = arith.addf %65, %66 : vector<40x128xf32>
    %c1_46 = arith.constant 1 : index
    %c0_47 = arith.constant 0 : index
    %c0_48 = arith.constant 0 : index
    %68 = vector.load %arg3[%c1_46, %c0_47, %c0_48] : memref<2x3x128xf32, #tpu.memory_space<vmem>>, vector<1x3x128xf32>
    %69 = vector.shape_cast %68 : vector<1x3x128xf32> to vector<3x128xf32>
    %70 = vector.extract_strided_slice %69 {offsets = [0, 0], sizes = [1, 128], strides = [1, 1]} : vector<3x128xf32> to vector<1x128xf32>
    %71 = vector.broadcast %70 : vector<1x128xf32> to vector<40x128xf32>
    %72 = arith.addf %67, %71 : vector<40x128xf32>
    %cst_49 = arith.constant 0.000000e+00 : f32
    %73 = vector.broadcast %cst_49 : f32 to vector<40x128xf32>
    %74 = arith.maximumf %72, %73 : vector<40x128xf32>
    %75 = arith.mulf %74, %2 : vector<40x128xf32>
    %cst_50 = arith.constant dense<0.000000e+00> : vector<128xf32>
    %76 = vector.multi_reduction <add>, %75, %cst_50 [0] : vector<40x128xf32> to vector<128xf32>
    %77 = vector.shape_cast %76 : vector<128xf32> to vector<1x128xf32>
    %cst_51 = arith.constant dense<0.000000e+00> : vector<1x128xf32>
    %78 = tpu.matmul %77, %3, %cst_51 {dimension_numbers = #tpu.dot_dimension_numbers<[1], [0], [0], [1], [0, 0, 1, 1], [], []>} : vector<1x128xf32>, vector<128x128xf32>, vector<1x128xf32> -> vector<1x128xf32>
    %cst_52 = arith.constant 0.001953125 : f32
    %79 = vector.broadcast %cst_52 : f32 to vector<1x128xf32>
    %80 = arith.mulf %79, %78 : vector<1x128xf32>
    %81 = vector.broadcast %80 : vector<1x128xf32> to vector<40x128xf32>
    %82 = arith.subf %74, %81 : vector<40x128xf32>
    %83 = arith.mulf %82, %2 : vector<40x128xf32>
    %84 = arith.mulf %83, %83 : vector<40x128xf32>
    %cst_53 = arith.constant dense<0.000000e+00> : vector<128xf32>
    %85 = vector.multi_reduction <add>, %84, %cst_53 [0] : vector<40x128xf32> to vector<128xf32>
    %86 = vector.shape_cast %85 : vector<128xf32> to vector<1x128xf32>
    %cst_54 = arith.constant dense<0.000000e+00> : vector<1x128xf32>
    %87 = tpu.matmul %86, %3, %cst_54 {dimension_numbers = #tpu.dot_dimension_numbers<[1], [0], [0], [1], [0, 0, 1, 1], [], []>} : vector<1x128xf32>, vector<128x128xf32>, vector<1x128xf32> -> vector<1x128xf32>
    %cst_55 = arith.constant 0.001953125 : f32
    %88 = vector.broadcast %cst_55 : f32 to vector<1x128xf32>
    %89 = arith.mulf %88, %87 : vector<1x128xf32>
    %90 = vector.extract_strided_slice %69 {offsets = [1, 0], sizes = [1, 128], strides = [1, 1]} : vector<3x128xf32> to vector<1x128xf32>
    %cst_56 = arith.constant 9.99999974E-6 : f32
    %91 = vector.broadcast %cst_56 : f32 to vector<1x128xf32>
    %92 = arith.addf %89, %91 : vector<1x128xf32>
    %93 = math.rsqrt %92 : vector<1x128xf32>
    %94 = arith.mulf %90, %93 : vector<1x128xf32>
    %95 = vector.extract_strided_slice %69 {offsets = [2, 0], sizes = [1, 128], strides = [1, 1]} : vector<3x128xf32> to vector<1x128xf32>
    %96 = arith.mulf %80, %94 : vector<1x128xf32>
    %97 = arith.subf %95, %96 : vector<1x128xf32>
    %98 = vector.broadcast %94 : vector<1x128xf32> to vector<40x128xf32>
    %99 = arith.mulf %74, %98 : vector<40x128xf32>
    %100 = vector.broadcast %97 : vector<1x128xf32> to vector<40x128xf32>
    %101 = arith.addf %99, %100 : vector<40x128xf32>
    %102 = arith.mulf %101, %2 : vector<40x128xf32>
    %c0_57 = arith.constant 0 : index
    %c256 = arith.constant 256 : index
    %103 = vector.load %arg6[%c0_57, %c256] : memref<40x384xf32, #tpu.memory_space<vmem>>, vector<40x128xf32>
    tpu.vector_store %arg6[%c0_57, %c256], %102 {strides = array<i32>} : memref<40x384xf32, #tpu.memory_space<vmem>>, vector<40x128xf32>,
    return
  }
}

</mosaic_0001>

<bundles_post_ra>
// kernel: _dense_block_forward_impl.1
= control target key start
LH: loop header
LB: loop body
LE: loop exit
PB: predicated region body
PF: predicated region fallthrough
CT: control target
= control target key end

     0   :  { %11 = vsyncpa [#allocation3], 0  ;;  %s2217_s21 = smov [#allocation2]   ;;  %s2928_s0 = inlined_call_operand.vmem [shape: f32[40,128], index: 0, kind: input, shape index: {}]   ;;  %s2929_s1 = inlined_call_operand.vmem [shape: f32[40,128], index: 1, kind: input, shape index: {}]   ;;  %s2930_s2 = inlined_call_operand.vmem [shape: f32[128,128], index: 2, kind: input, shape index: {}]   ;;  %s2931_s3 = inlined_call_operand.vmem [shape: f32[2,3,128], index: 3, kind: input, shape index: {}]   ;;  %s2932_s4 = inlined_call_operand.vmem [shape: f32[3,128,128], index: 4, kind: input, shape index: {}]   ;;  %s2933_s5 = inlined_call_operand.hbm [shape: f32[3,256,128], index: 5, kind: input, shape index: {}]   ;;  %s2934_s6 = inlined_call_operand.vmem [shape: f32[40,384], index: 6, kind: output, shape index: {}]  }
   0x1   :  { %s27_s22 = sshll.u32 %s2217_s21, 4  ;;  %s2193_s25 = scalar_lea.hbm %s2933_s5, 12288  ;;  %s28_s22 = int_to_ptr.vmem [resolvable:$true] %s27_s22 }
   0x2   :  { %p2194_p0 = scmp.ne.s32.totalorder %s2933_s5, %s2193_s25  ;;  %p2197_p1 = scmp.lt.u32.totalorder %s2193_s25, %s2933_s5 }
   0x4   :  { %p2199_p2 = pnand %p2197_p1, %p2194_p0 }
   0x6   :  { %2202 = shalt.err (!%p2199_p2)
}
   0x7   :  { %s2203_s30 = scalar_lea.vmem %s28_s22, 12288  ;;  %p2208_p4 = scmp.lt.s32.totalorder %s28_s22, %s28_s22 }
   0x8   :  { %p2204_p3 = scmp.ne.s32.totalorder %s28_s22, %s2203_s30  ;;  %p2209_p5 = scmp.lt.s32.totalorder %s2203_s30, %s2203_s30 }
   0xa   :  { %p2210_p6 = por %p2209_p5, %p2208_p4 }
   0xc   :  { %p2211_p7 = pnand %p2210_p6, %p2204_p3 }
   0xe   :  { %2214 = shalt.err (!%p2211_p7)
}
   0xf   :  { %s2218_s7 = smov 128   ;;  %s2219_s8 = smov 8  }
  0x10   :  { %33 = dma.hbm_to_vmem [thread:$0]  %s2933_s5, 12288, %s28_s22, [#allocation3], %s2218_s7, %s2218_s7, %s2219_s8  }
  0x11   :  { %2215 = dma.done.wait [#allocation3], 12288  }
  0x12   :  { %2216 = vsyncadd [#allocation3], 4294955008  ;;  %v2220_v0 = vmov 0.0|0.0   ;;  %vm2221_vm0 = vmmov 0   ;;  %v2222_v1 = vmov 0.0   ;;  %v73_v2 = vld [vmem:[%s2932_s4] sm:$0xff] }
  0x13   :  { %1913 = vmatprep.subr.bf16.mxu0 %v2220_v0  ;;  %1937 = vmatprep.subr.bf16.mxu1 %v2220_v0  ;;  %v74_v3 = vld [vmem:[%s2932_s4 + $0x8] sm:$0xff]  ;;  %v1327_v4 = vld [vmem:[%s2932_s4 + $0x80] sm:$0xff]  ;;  %v75_v7 = vld [vmem:[%s2932_s4 + $0x10] sm:$0xff] }
  0x14   :  { %1664 = vmatprep.mubr.msk.f32.mxu0 %vm2221_vm0, %v2222_v1  ;;  %1711 = vmatprep.mubr.msk.f32.mxu1 %vm2221_vm0, %v2222_v1  ;;  %v1914_v5 = vpack.c.bf16 %v74_v3, %v73_v2  ;;  %v1328_v6 = vld [vmem:[%s2932_s4 + $0x88] sm:$0xff]  ;;  %v76_v8 = vld [vmem:[%s2932_s4 + $0x18] sm:$0xff]  ;;  %v1329_v10 = vld [vmem:[%s2932_s4 + $0x90] sm:$0xff] }
  0x15   :  { %v1938_v9 = vpack.c.bf16 %v1328_v6, %v1327_v4  ;;  %v1330_v11 = vld [vmem:[%s2932_s4 + $0x98] sm:$0xff]  ;;  %v1917_v12 = vpack.c.bf16 %v76_v8, %v75_v7  ;;  %v77_v14 = vld [vmem:[%s2932_s4 + $0x20] sm:$0xff]  ;;  %v78_v15 = vld [vmem:[%s2932_s4 + $0x28] sm:$0xff] }
  0x16   :  { %1915 = vmatpush3.bf16.msra.mxu0 %v1914_v5  ;;  %v1941_v13 = vpack.c.bf16 %v1330_v11, %v1329_v10  ;;  %v1331_v16 = vld [vmem:[%s2932_s4 + $0xa0] sm:$0xff]  ;;  %v1332_v17 = vld [vmem:[%s2932_s4 + $0xa8] sm:$0xff]  ;;  %v1920_v18 = vpack.c.bf16 %v78_v15, %v77_v14  ;;  %v79_v20 = vld [vmem:[%s2932_s4 + $0x30] sm:$0xff] }
  0x17   :  { %1916 = vmatprep.subr.bf16.mxu0 %v2220_v0  ;;  %1939 = vmatpush3.bf16.msra.mxu1 %v1938_v9  ;;  %v1944_v19 = vpack.c.bf16 %v1332_v17, %v1331_v16  ;;  %v80_v21 = vld [vmem:[%s2932_s4 + $0x38] sm:$0xff]  ;;  %v1333_v22 = vld [vmem:[%s2932_s4 + $0xb0] sm:$0xff]  ;;  %v2331_v24 = vld [vmem:[%s2928_s0] sm:$0xff] }
  0x18   :  { %1940 = vmatprep.subr.bf16.mxu1 %v2220_v0  ;;  %v1334_v23 = vld [vmem:[%s2932_s4 + $0xb8] sm:$0xff]  ;;  %v1923_v25 = vpack.c.bf16 %v80_v21, %v79_v20  ;;  %42 = vst [vmem:[%s2934_s6] sm:$0xff] %v2331_v24  ;;  %v2340_v26 = vld [vmem:[%s2928_s0 + $0x8] sm:$0xff]  ;;  %v81_v28 = vld [vmem:[%s2932_s4 + $0x40] sm:$0xff] }
  0x19   :  { %v1947_v27 = vpack.c.bf16 %v1334_v23, %v1333_v22  ;;  %v82_v29 = vld [vmem:[%s2932_s4 + $0x48] sm:$0xff]  ;;  %43 = vst [vmem:[%s2934_s6 + $0x18] sm:$0xff] %v2340_v26  ;;  %v2356_v30 = vld [vmem:[%s2928_s0 + $0x10] sm:$0xff]  ;;  %v1335_v31 = vld [vmem:[%s2932_s4 + $0xc0] sm:$0xff] }
  0x1a   :  { %1918 = vmatpush3.bf16.msra.mxu0 %v1917_v12  ;;  %v1336_v32 = vld [vmem:[%s2932_s4 + $0xc8] sm:$0xff]  ;;  %44 = vst [vmem:[%s2934_s6 + $0x30] sm:$0xff] %v2356_v30  ;;  %v2372_v33 = vld [vmem:[%s2928_s0 + $0x18] sm:$0xff]  ;;  %v2381_v34 = vld [vmem:[%s2928_s0 + $0x20] sm:$0xff]  ;;  %v1926_v35 = vpack.c.bf16 %v82_v29, %v81_v28 }
  0x1b   :  { %1919 = vmatprep.subr.bf16.mxu0 %v2220_v0  ;;  %1942 = vmatpush3.bf16.msra.mxu1 %v1941_v13  ;;  %45 = vst [vmem:[%s2934_s6 + $0x48] sm:$0xff] %v2372_v33  ;;  %46 = vst [vmem:[%s2934_s6 + $0x60] sm:$0xff] %v2381_v34  ;;  %v1950_v36 = vpack.c.bf16 %v1336_v32, %v1335_v31  ;;  %v83_v37 = vld [vmem:[%s2932_s4 + $0x50] sm:$0xff]  ;;  %v84_v38 = vld [vmem:[%s2932_s4 + $0x58] sm:$0xff] }
  0x1c   :  { %1943 = vmatprep.subr.bf16.mxu1 %v2220_v0  ;;  %v1337_v39 = vld [vmem:[%s2932_s4 + $0xd0] sm:$0xff]  ;;  %v1338_v40 = vld [vmem:[%s2932_s4 + $0xd8] sm:$0xff]  ;;  %v1929_v41 = vpack.c.bf16 %v84_v38, %v83_v37  ;;  %v85_v43 = vld [vmem:[%s2932_s4 + $0x60] sm:$0xff] }
  0x1d   :  { %v1953_v42 = vpack.c.bf16 %v1338_v40, %v1337_v39  ;;  %v86_v44 = vld [vmem:[%s2932_s4 + $0x68] sm:$0xff]  ;;  %v1339_v45 = vld [vmem:[%s2932_s4 + $0xe0] sm:$0xff]  ;;  %v87_v49 = vld [vmem:[%s2932_s4 + $0x70] sm:$0xff] }
  0x1e   :  { %1921 = vmatpush3.bf16.msra.mxu0 %v1920_v18  ;;  %v1340_v46 = vld [vmem:[%s2932_s4 + $0xe8] sm:$0xff]  ;;  %v1932_v47 = vpack.c.bf16 %v86_v44, %v85_v43  ;;  %v88_v50 = vld [vmem:[%s2932_s4 + $0x78] sm:$0xff]  ;;  %v1341_v51 = vld [vmem:[%s2932_s4 + $0xf0] sm:$0xff]  ;;  %v398_v44 = vlaneseq }
  0x1f   :  { %1922 = vmatprep.subr.bf16.mxu0 %v2220_v0  ;;  %1945 = vmatpush3.bf16.msra.mxu1 %v1944_v19  ;;  %v1956_v48 = vpack.c.bf16 %v1340_v46, %v1339_v45  ;;  %v1342_v52 = vld [vmem:[%s2932_s4 + $0xf8] sm:$0xff]  ;;  %v1935_v53 = vpack.c.bf16 %v88_v50, %v87_v49  ;;  %v1343_v55 = vld [vmem:[%s2932_s4 + $0x100] sm:$0xff]  ;;  %v1344_v56 = vld [vmem:[%s2932_s4 + $0x108] sm:$0xff] }
  0x20   :  { %1946 = vmatprep.subr.bf16.mxu1 %v2220_v0  ;;  %v1959_v54 = vpack.c.bf16 %v1342_v52, %v1341_v51  ;;  %v1962_v57 = vpack.c.bf16 %v1344_v56, %v1343_v55  ;;  %v1345_v58 = vld [vmem:[%s2932_s4 + $0x110] sm:$0xff]  ;;  %v1346_v59 = vld [vmem:[%s2932_s4 + $0x118] sm:$0xff]  ;;  %v1347_v61 = vld [vmem:[%s2932_s4 + $0x120] sm:$0xff]  ;;  %v2628_v46 = vshrl.u32 %v398_v44, 7 }
  0x21   :  { %v1965_v60 = vpack.c.bf16 %v1346_v59, %v1345_v58  ;;  %v1348_v62 = vld [vmem:[%s2932_s4 + $0x128] sm:$0xff]  ;;  %v1349_v2 = vld [vmem:[%s2932_s4 + $0x130] sm:$0xff]  ;;  %v1350_v3 = vld [vmem:[%s2932_s4 + $0x138] sm:$0xff] }
  0x22   :  { %1924 = vmatpush3.bf16.msra.mxu0 %v1923_v25  ;;  %v1968_v63 = vpack.c.bf16 %v1348_v62, %v1347_v61  ;;  %v1971_v4 = vpack.c.bf16 %v1350_v3, %v1349_v2  ;;  %v1351_v5 = vld [vmem:[%s2932_s4 + $0x140] sm:$0xff]  ;;  %v1352_v6 = vld [vmem:[%s2932_s4 + $0x148] sm:$0xff]  ;;  %v1353_v8 = vld [vmem:[%s2932_s4 + $0x150] sm:$0xff]  ;;  %vm400_vm1 = vcmp.lt.s32.totalorder %v2628_v46, 1  ;;  %vm416_vm2 = vcmp.lt.s32.totalorder %v2628_v46, 7 }
  0x23   :  { %1925 = vmatprep.subr.bf16.mxu0 %v2220_v0  ;;  %1948 = vmatpush3.bf16.msra.mxu1 %v1947_v27  ;;  %v1974_v7 = vpack.c.bf16 %v1352_v6, %v1351_v5  ;;  %v1354_v9 = vld [vmem:[%s2932_s4 + $0x158] sm:$0xff]  ;;  %v1355_v11 = vld [vmem:[%s2932_s4 + $0x160] sm:$0xff]  ;;  %v1356_v12 = vld [vmem:[%s2932_s4 + $0x168] sm:$0xff] }
  0x24   :  { %1949 = vmatprep.subr.bf16.mxu1 %v2220_v0  ;;  %v1977_v10 = vpack.c.bf16 %v1354_v9, %v1353_v8  ;;  %v1980_v13 = vpack.c.bf16 %v1356_v12, %v1355_v11  ;;  %v1357_v14 = vld [vmem:[%s2932_s4 + $0x170] sm:$0xff]  ;;  %v1358_v15 = vld [vmem:[%s2932_s4 + $0x178] sm:$0xff]  ;;  %v52_v17 = vld [vmem:[%s2930_s2] sm:$0xff] }
  0x25   :  { %v1983_v16 = vpack.c.bf16 %v1358_v15, %v1357_v14  ;;  %v53_v18 = vld [vmem:[%s2930_s2 + $0x8] sm:$0xff]  ;;  %v54_v20 = vld [vmem:[%s2930_s2 + $0x10] sm:$0xff]  ;;  %v55_v21 = vld [vmem:[%s2930_s2 + $0x18] sm:$0xff] }
  0x26   :  { %1927 = vmatpush3.bf16.msra.mxu0 %v1926_v35  ;;  %v2540_v19 = vpack.c.bf16 %v53_v18, %v52_v17  ;;  %v2552_v22 = vpack.c.bf16 %v55_v21, %v54_v20  ;;  %v56_v23 = vld [vmem:[%s2930_s2 + $0x20] sm:$0xff]  ;;  %v57_v25 = vld [vmem:[%s2930_s2 + $0x28] sm:$0xff]  ;;  %v58_v28 = vld [vmem:[%s2930_s2 + $0x30] sm:$0xff] }
  0x27   :  { %1928 = vmatprep.subr.bf16.mxu0 %v2220_v0  ;;  %1951 = vmatpush3.bf16.msra.mxu1 %v1950_v36  ;;  %v2564_v27 = vpack.c.bf16 %v57_v25, %v56_v23  ;;  %v59_v29 = vld [vmem:[%s2930_s2 + $0x38] sm:$0xff]  ;;  %v60_v32 = vld [vmem:[%s2930_s2 + $0x40] sm:$0xff]  ;;  %v62_v35 = vld [vmem:[%s2930_s2 + $0x50] sm:$0xff] }
  0x28   :  { %1952 = vmatprep.subr.bf16.mxu1 %v2220_v0  ;;  %v2576_v31 = vpack.c.bf16 %v59_v29, %v58_v28  ;;  %v63_v36 = vld [vmem:[%s2930_s2 + $0x58] sm:$0xff]  ;;  %v64_v38 = vld [vmem:[%s2930_s2 + $0x60] sm:$0xff]  ;;  %v65_v39 = vld [vmem:[%s2930_s2 + $0x68] sm:$0xff] }
  0x29   :  { %v2600_v37 = vpack.c.bf16 %v63_v36, %v62_v35  ;;  %v2609_v40 = vpack.c.bf16 %v65_v39, %v64_v38  ;;  %v2650_v35 = vld [vmem:[%s2931_s3] sm:$0x7] }
  0x2a   :  { %1930 = vmatpush3.bf16.msra.mxu0 %v1929_v41  ;;  %v66_v41 = vld [vmem:[%s2930_s2 + $0x70] sm:$0xff] }
  0x2b   :  { %1931 = vmatprep.subr.bf16.mxu0 %v2220_v0  ;;  %1954 = vmatpush3.bf16.msra.mxu1 %v1953_v42  ;;  %v67_v42 = vld [vmem:[%s2930_s2 + $0x78] sm:$0xff] }
  0x2c   :  { %1955 = vmatprep.subr.bf16.mxu1 %v2220_v0  ;;  %v2621_v43 = vpack.c.bf16 %v67_v42, %v66_v41 }
  0x2e   :  { %1933 = vmatpush3.bf16.msra.mxu0 %v1932_v47 }
  0x2f   :  { %1934 = vmatprep.subr.bf16.mxu0 %v2220_v0  ;;  %1957 = vmatpush3.bf16.msra.mxu1 %v1956_v48 }
  0x30   :  { %1958 = vmatprep.subr.bf16.mxu1 %v2220_v0 }
  0x32   :  { %1936 = vmatpush3.bf16.msra.mxu0 %v1935_v53 }
  0x33   :  { %1960 = vmatpush3.bf16.msra.mxu1 %v1959_v54  ;;  %1961 = vmatprep.subr.bf16.mxu0 %v2220_v0 }
  0x34   :  { %1985 = vmatprep.subr.bf16.mxu1 %v2220_v0 }
  0x35   :  { %1665 = vmatmul.mubr.f32.vlgmr.msra.gmra.mrb[0].mxu0 %v2331_v24 }
  0x36   :  { %1963 = vmatpush3.bf16.msra.mxu0 %v1962_v57  ;;  %1667 = vmatprep.mubr.msk.f32.mxu0 %vm2221_vm0, %v2222_v1 }
  0x37   :  { %1712 = vmatmul.mubr.f32.vlgmr.msra.gmra.mrb[0].mxu1 %v2331_v24  ;;  %1964 = vmatprep.subr.bf16.mxu0 %v2220_v0 }
  0x38   :  { %1714 = vmatprep.mubr.msk.f32.mxu1 %vm2221_vm0, %v2222_v1  ;;  %1987 = vmatpush3.bf16.msra.mxu1 %v2540_v19 }
  0x39   :  { %1668 = vmatmul.mubr.f32.gmra.mrb[2].mxu0 %v2340_v26  ;;  %1988 = vmatprep.subr.bf16.mxu1 %v2220_v0 }
  0x3a   :  { %1966 = vmatpush3.bf16.msra.mxu0 %v1965_v60  ;;  %1670 = vmatprep.mubr.msk.f32.mxu0 %vm2221_vm0, %v2222_v1 }
  0x3b   :  { %1715 = vmatmul.mubr.f32.gmra.mrb[2].mxu1 %v2340_v26  ;;  %1967 = vmatprep.subr.bf16.mxu0 %v2220_v0 }
  0x3c   :  { %1717 = vmatprep.mubr.msk.f32.mxu1 %vm2221_vm0, %v2222_v1  ;;  %1990 = vmatpush3.bf16.msra.mxu1 %v2552_v22 }
  0x3d   :  { %1671 = vmatmul.mubr.f32.gmra.mrb[4].mxu0 %v2356_v30  ;;  %1991 = vmatprep.subr.bf16.mxu1 %v2220_v0 }
  0x3e   :  { %1969 = vmatpush3.bf16.msra.mxu0 %v1968_v63  ;;  %1673 = vmatprep.mubr.msk.f32.mxu0 %vm2221_vm0, %v2222_v1 }
  0x3f   :  { %1970 = vmatprep.subr.bf16.mxu0 %v2220_v0  ;;  %1718 = vmatmul.mubr.f32.gmra.mrb[4].mxu1 %v2356_v30 }
  0x40   :  { %1720 = vmatprep.mubr.msk.f32.mxu1 %vm2221_vm0, %v2222_v1  ;;  %1993 = vmatpush3.bf16.msra.mxu1 %v2564_v27 }
  0x41   :  { %1674 = vmatmul.mubr.f32.gmra.mrb[6].mxu0 %v2372_v33  ;;  %1994 = vmatprep.subr.bf16.mxu1 %v2220_v0 }
  0x42   :  { %1972 = vmatpush3.bf16.msra.mxu0 %v1971_v4  ;;  %1676 = vmatprep.mubr.msk.f32.mxu0 %vm2221_vm0, %v2222_v1 }
  0x43   :  { %1973 = vmatprep.subr.bf16.mxu0 %v2220_v0  ;;  %1721 = vmatmul.mubr.f32.gmra.mrb[6].mxu1 %v2372_v33 }
  0x44   :  { %1723 = vmatprep.mubr.msk.f32.mxu1 %vm2221_vm0, %v2222_v1  ;;  %1996 = vmatpush3.bf16.msra.mxu1 %v2576_v31 }
  0x45   :  { %1677 = vmatmul.mubr.f32.gmra.mrb[8].mxu0 %v2381_v34  ;;  %1997 = vmatprep.subr.bf16.mxu1 %v2220_v0 }
  0x46   :  { %1975 = vmatpush3.bf16.msra.mxu0 %v1974_v7  ;;  %1758 = vmatprep.mubr.msk.f32.mxu0 %vm2221_vm0, %v2222_v1 }
  0x47   :  { %1976 = vmatprep.subr.bf16.mxu0 %v2220_v0  ;;  %1724 = vmatmul.mubr.f32.gmra.mrb[8].mxu1 %v2381_v34 }
  0x48   :  { %1805 = vmatprep.mubr.msk.f32.mxu1 %vm2221_vm0, %v2222_v1 }
  0x4a   :  { %1978 = vmatpush3.bf16.msra.mxu0 %v1977_v10 }
  0x4b   :  { %1979 = vmatprep.subr.bf16.mxu0 %v2220_v0 }
  0x4e   :  { %1981 = vmatpush3.bf16.msra.mxu0 %v1980_v13 }
  0x4f   :  { %1982 = vmatprep.subr.bf16.mxu0 %v2220_v0 }
  0x52   :  { %1984 = vmatpush3.bf16.msra.mxu0 %v1983_v16 }
  0x53   :  { %2009 = vmatprep.subr.bf16.mxu0 %v2220_v0 }
  0x55   :  { %1759 = vmatmul.mubr.f32.vlgmr.msra.gmra.mrb[10].mxu0 %v2331_v24 }
  0x56   :  { %1761 = vmatprep.mubr.msk.f32.mxu0 %vm2221_vm0, %v2222_v1  ;;  %2011 = vmatpush3.bf16.msra.mxu0 %v2540_v19 }
  0x57   :  { %2012 = vmatprep.subr.bf16.mxu0 %v2220_v0 }
  0x59   :  { %1762 = vmatmul.mubr.f32.gmra.mrb[12].mxu0 %v2340_v26 }
  0x5a   :  { %1764 = vmatprep.mubr.msk.f32.mxu0 %vm2221_vm0, %v2222_v1  ;;  %2014 = vmatpush3.bf16.msra.mxu0 %v2552_v22 }
  0x5b   :  { %2015 = vmatprep.subr.bf16.mxu0 %v2220_v0 }
  0x5d   :  { %1765 = vmatmul.mubr.f32.gmra.mrb[14].mxu0 %v2356_v30 }
  0x5e   :  { %1767 = vmatprep.mubr.msk.f32.mxu0 %vm2221_vm0, %v2222_v1  ;;  %2017 = vmatpush3.bf16.msra.mxu0 %v2564_v27 }
  0x5f   :  { %2018 = vmatprep.subr.bf16.mxu0 %v2220_v0 }
  0x61   :  { %1768 = vmatmul.mubr.f32.gmra.mrb[16].mxu0 %v2372_v33  ;;  %v61_v33 = vld [vmem:[%s2930_s2 + $0x48] sm:$0xff] }
  0x62   :  { %1770 = vmatprep.mubr.msk.f32.mxu0 %vm2221_vm0, %v2222_v1  ;;  %2020 = vmatpush3.bf16.msra.mxu0 %v2576_v31 }
  0x63   :  { %2021 = vmatprep.subr.bf16.mxu0 %v2220_v0 }
  0x65   :  { %1771 = vmatmul.mubr.f32.gmra.mrb[18].mxu0 %v2381_v34  ;;  %v2588_v34 = vpack.c.bf16 %v61_v33, %v60_v32  ;;  %v2643_v32 = vsub.s32 0, %v2628_v46 }
  0x66   :  { %1840 = vmatprep.mubr.msk.f32.mxu0 %vm2221_vm0, %v2222_v1 }
  0x67   :  { %1999 = vmatpush3.bf16.msra.mxu1 %v2588_v34  ;;  %2023 = vmatpush3.bf16.msra.mxu0 %v2588_v34  ;;  %v431_v42 = vrot.slane %v2650_v35, %v2643_v32 }
  0x68   :  { %2000 = vmatprep.subr.bf16.mxu1 %v2220_v0  ;;  %2024 = vmatprep.subr.bf16.mxu0 %v2220_v0 }
  0x6b   :  { %2002 = vmatpush3.bf16.msra.mxu1 %v2600_v37  ;;  %2026 = vmatpush3.bf16.msra.mxu0 %v2600_v37 }
  0x6c   :  { %2003 = vmatprep.subr.bf16.mxu1 %v2220_v0  ;;  %2027 = vmatprep.subr.bf16.mxu0 %v2220_v0 }
  0x6f   :  { %2005 = vmatpush3.bf16.msra.mxu1 %v2609_v40  ;;  %2029 = vmatpush3.bf16.msra.mxu0 %v2609_v40 }
  0x70   :  { %2006 = vmatprep.subr.bf16.mxu1 %v2220_v0  ;;  %2030 = vmatprep.subr.bf16.mxu0 %v2220_v0 }
  0x73   :  { %2008 = vmatpush3.bf16.msra.mxu1 %v2621_v43  ;;  %2032 = vmatpush3.bf16.msra.mxu0 %v2621_v43 }
 0x108   :  { %v155_v45 = vpop.f32.mrb[0].mxu0 }
 0x109   :  { %v1666_v47 = vpop.f32.mrb[1].mxu0  ;;  %v393_v51 = vrot.slane %v155_v45, 7 }
 0x10a   :  { %v262_v48 = vpop.f32.mrb[0].mxu1 }
 0x10b   :  { %v1713_v49 = vpop.f32.mrb[1].mxu1 }
 0x10c   :  { %v160_v50 = vpop.f32.mrb[2].mxu0 }
 0x10d   :  { %v394_v52 = vrot.slane %v160_v50, 7  ;;  %v1669_v53 = vpop.f32.mrb[3].mxu0 }
 0x10e   :  { %v267_v54 = vpop.f32.mrb[2].mxu1 }
 0x10f   :  { %v404_v55 = vsel %vm400_vm1, %v393_v51, %v394_v52  ;;  %v1716_v56 = vpop.f32.mrb[3].mxu1 }
 0x110   :  { %v407_v57 = vadd.f32 %v404_v55, %v267_v54  ;;  %v165_v58 = vpop.f32.mrb[4].mxu0  ;;  %v2663_v56 = vld [vmem:[%s2929_s1 + $0x8] sm:$0xff] }
 0x111   :  { %v395_v59 = vrot.slane %v165_v58, 7  ;;  %v1672_v60 = vpop.f32.mrb[5].mxu0 }
 0x112   :  { %v272_v61 = vpop.f32.mrb[4].mxu1 }
 0x113   :  { %v403_v62 = vsel %vm400_vm1, %v394_v52, %v395_v59  ;;  %v1719_v63 = vpop.f32.mrb[5].mxu1 }
 0x114   :  { %v170_v2 = vpop.f32.mrb[6].mxu0  ;;  %v408_v3 = vadd.f32 %v403_v62, %v272_v61  ;;  %v2670_v61 = vld [vmem:[%s2929_s1] sm:$0xff]  ;;  %v2675_v62 = vld [vmem:[%s2929_s1 + $0x10] sm:$0xff] }
 0x115   :  { %v396_v4 = vrot.slane %v170_v2, 7  ;;  %v1675_v5 = vpop.f32.mrb[7].mxu0 }
 0x116   :  { %v277_v6 = vpop.f32.mrb[6].mxu1 }
 0x117   :  { %v402_v7 = vsel %vm400_vm1, %v395_v59, %v396_v4  ;;  %v1722_v8 = vpop.f32.mrb[7].mxu1 }
 0x118   :  { %v175_v9 = vpop.f32.mrb[8].mxu0  ;;  %v409_v10 = vadd.f32 %v402_v7, %v277_v6 }
 0x119   :  { %v397_v11 = vrot.slane %v175_v9, 7  ;;  %v1678_v12 = vpop.f32.mrb[9].mxu0 }
 0x11a   :  { %v282_v13 = vpop.f32.mrb[8].mxu1  ;;  %v2692_v12 = vld [vmem:[%s2929_s1 + $0x18] sm:$0xff] }
 0x11b   :  { %v405_v14 = vsel %vm400_vm1, %v397_v11, %v393_v51  ;;  %v401_v15 = vsel %vm400_vm1, %v396_v4, %v397_v11  ;;  %v1725_v16 = vpop.f32.mrb[9].mxu1 }
 0x11c   :  { %v406_v17 = vadd.f32 %v405_v14, %v262_v48  ;;  %v410_v18 = vadd.f32 %v401_v15, %v282_v13 }
 0x128   :  { %v369_v20 = vpop.f32.mrb[10].mxu0 }
 0x129   :  { %v1760_v21 = vpop.f32.mrb[11].mxu0  ;;  %v411_v25 = vrot.slane %v369_v20, 1 }
 0x12c   :  { %v374_v23 = vpop.f32.mrb[12].mxu0 }
 0x12d   :  { %v412_v28 = vrot.slane %v374_v23, 1  ;;  %v1763_v29 = vpop.f32.mrb[13].mxu0 }
 0x12f   :  { %v420_v33 = vsel %vm416_vm2, %v411_v25, %v412_v28 }
 0x130   :  { %v422_v36 = vadd.f32 %v420_v33, %v406_v17  ;;  %v379_v38 = vpop.f32.mrb[14].mxu0 }
 0x131   :  { %v413_v39 = vrot.slane %v379_v38, 1  ;;  %v1766_v41 = vpop.f32.mrb[15].mxu0 }
 0x132   :  { %v432_v50 = vadd.f32 %v431_v42, %v422_v36 }
 0x133   :  { %v419_v44 = vsel %vm416_vm2, %v412_v28, %v413_v39 }
 0x134   :  { %v423_v45 = vadd.f32 %v419_v44, %v407_v57  ;;  %v384_v47 = vpop.f32.mrb[16].mxu0  ;;  %v2665_v57 = vmax.f32 %v432_v50, 0.0 }
 0x135   :  { %v414_v48 = vrot.slane %v384_v47, 1  ;;  %v1769_v49 = vpop.f32.mrb[17].mxu0 }
 0x136   :  { %v433_v51 = vadd.f32 %v431_v42, %v423_v45  ;;  %v442_v7 = vmul.f32 %v2665_v57, %v2670_v61 }
 0x137   :  { %v418_v52 = vsel %vm416_vm2, %v413_v39, %v414_v48 }
 0x138   :  { %v2658_v53 = vmax.f32 %v433_v51, 0.0  ;;  %v424_v54 = vadd.f32 %v418_v52, %v408_v3  ;;  %v389_v55 = vpop.f32.mrb[18].mxu0 }
 0x139   :  { %v415_v58 = vrot.slane %v389_v55, 1  ;;  %v1772_v59 = vpop.f32.mrb[19].mxu0 }
 0x13a   :  { %v434_v60 = vadd.f32 %v431_v42, %v424_v54  ;;  %v443_v3 = vmul.f32 %v2658_v53, %v2663_v56 }
 0x13b   :  { %v417_v63 = vsel %vm416_vm2, %v414_v48, %v415_v58  ;;  %v421_v2 = vsel %vm416_vm2, %v415_v58, %v411_v25 }
 0x13c   :  { %v2683_v4 = vmax.f32 %v434_v60, 0.0  ;;  %v425_v5 = vadd.f32 %v417_v63, %v409_v10  ;;  %v426_v6 = vadd.f32 %v421_v2, %v410_v18  ;;  %v447_v13 = vadd.f32 %v443_v3, %v442_v7  ;;  %v2701_v10 = vld [vmem:[%s2929_s1 + $0x20] sm:$0xff] }
 0x13e   :  { %v444_v8 = vmul.f32 %v2683_v4, %v2675_v62  ;;  %v435_v9 = vadd.f32 %v431_v42, %v425_v5  ;;  %v436_v11 = vadd.f32 %v431_v42, %v426_v6 }
 0x140   :  { %v2694_v14 = vmax.f32 %v435_v9, 0.0  ;;  %v2696_v15 = vmax.f32 %v436_v11, 0.0  ;;  %v448_v16 = vadd.f32 %v447_v13, %v444_v8 }
 0x142   :  { %v445_v17 = vmul.f32 %v2694_v14, %v2692_v12  ;;  %v446_v18 = vmul.f32 %v2696_v15, %v2701_v10 }
 0x144   :  { %v449_v20 = vadd.f32 %v448_v16, %v445_v17 }
 0x146   :  { %v450_v21 = vadd.f32 %v449_v20, %v446_v18  ;;  %v696_v18 = vld [vmem:[#allocation2 + $0x80] sm:$0xff]  ;;  %v697_v20 = vld [vmem:[#allocation2 + $0x88] sm:$0xff] }
 0x148   :  { %v451_v23 = vrot.slane %v450_v21, 4 }
 0x14a   :  { %v452_v25 = vadd.f32 %v451_v23, %v450_v21  ;;  %v2033_v21 = vpack.c.bf16 %v697_v20, %v696_v18  ;;  %v680_v23 = vld [vmem:[#allocation2] sm:$0xff]  ;;  %v703_v18 = vld [vmem:[#allocation2 + $0xb8] sm:$0xff] }
 0x14c   :  { %v453_v28 = vrot.slane %v452_v25, 2  ;;  %2034 = vmatprep.subr.bf16.mxu1 %v2033_v21  ;;  %v686_v21 = vld [vmem:[#allocation2 + $0x30] sm:$0xff] }
 0x14e   :  { %v454_v29 = vadd.f32 %v453_v28, %v452_v25  ;;  %v681_v25 = vld [vmem:[#allocation2 + $0x8] sm:$0xff]  ;;  %v819_v28 = vld [vmem:[#allocation2 + $0x180] sm:$0xff] }
 0x150   :  { %v455_v33 = vrot.slane %v454_v29, 1 }
 0x152   :  { %v456_v36 = vadd.f32 %v455_v33, %v454_v29  ;;  %v2035_v29 = vpack.c.bf16 %v681_v25, %v680_v23  ;;  %v820_v33 = vld [vmem:[#allocation2 + $0x188] sm:$0xff]  ;;  %v687_v23 = vld [vmem:[#allocation2 + $0x38] sm:$0xff]  ;;  %v825_v25 = vld [vmem:[#allocation2 + $0x1b0] sm:$0xff] }
 0x154   :  { %1806 = vmatmul.mubr.f32.vlgmr.msra.gmra.mrb[10].mxu1 %v456_v36  ;;  %v803_v36 = vld [vmem:[#allocation2 + $0x100] sm:$0xff] }
 0x155   :  { %2036 = vmatpush3.bf16.msra.mxu1 %v2035_v29  ;;  %v826_v29 = vld [vmem:[#allocation2 + $0x1b8] sm:$0xff] }
 0x227   :  { %v523_v38 = vpop.f32.mrb[10].mxu1 }
 0x228   :  { %v2707_v39 = vmul.f32 0.001953125, %v523_v38  ;;  %v1807_v41 = vpop.f32.mrb[11].mxu1  ;;  %v804_v38 = vld [vmem:[#allocation2 + $0x108] sm:$0xff] }
 0x229   :  { %v2065_v41 = vpack.c.bf16 %v820_v33, %v819_v28  ;;  %v2047_v28 = vpack.c.bf16 %v687_v23, %v686_v21  ;;  %v809_v33 = vld [vmem:[#allocation2 + $0x130] sm:$0xff]  ;;  %v693_v21 = vld [vmem:[#allocation2 + $0x68] sm:$0xff]  ;;  %v831_v23 = vld [vmem:[#allocation2 + $0x1e0] sm:$0xff] }
 0x22a   :  { %v531_v42 = vrot.slane %v2707_v39, %v2643_v32 }
 0x22b   :  { %2066 = vmatprep.subr.bf16.mxu0 %v2065_v41 }
 0x22c   :  { %v532_v44 = vsub.f32 %v2665_v57, %v531_v42  ;;  %v533_v45 = vsub.f32 %v2658_v53, %v531_v42  ;;  %v534_v47 = vsub.f32 %v2683_v4, %v531_v42  ;;  %v535_v48 = vsub.f32 %v2694_v14, %v531_v42 }
 0x22d   :  { %v536_v49 = vsub.f32 %v2696_v15, %v531_v42  ;;  %v2067_v42 = vpack.c.bf16 %v804_v38, %v803_v36  ;;  %v810_v36 = vld [vmem:[#allocation2 + $0x138] sm:$0xff]  ;;  %v2077_v38 = vpack.c.bf16 %v826_v29, %v825_v25  ;;  %v815_v29 = vld [vmem:[#allocation2 + $0x160] sm:$0xff] }
 0x22e   :  { %v537_v50 = vmul.f32 %v532_v44, %v2670_v61  ;;  %v538_v51 = vmul.f32 %v533_v45, %v2663_v56  ;;  %v539_v52 = vmul.f32 %v534_v47, %v2675_v62  ;;  %v540_v54 = vmul.f32 %v535_v48, %v2692_v12  ;;  %v698_v44 = vld [vmem:[#allocation2 + $0x90] sm:$0xff]  ;;  %v699_v45 = vld [vmem:[#allocation2 + $0x98] sm:$0xff] }
 0x22f   :  { %v541_v59 = vmul.f32 %v536_v49, %v2701_v10  ;;  %v2037_v47 = vpack.c.bf16 %v699_v45, %v698_v44  ;;  %v682_v48 = vld [vmem:[#allocation2 + $0x10] sm:$0xff]  ;;  %v683_v49 = vld [vmem:[#allocation2 + $0x18] sm:$0xff]  ;;  %v2079_v41 = vpack.c.bf16 %v810_v36, %v809_v33  ;;  %v705_v44 = vld [vmem:[#allocation2 + $0xc8] sm:$0xff] }
 0x230   :  { %v542_v55 = vmul.f32 %v537_v50, %v537_v50  ;;  %v543_v58 = vmul.f32 %v538_v51, %v538_v51  ;;  %v544_v60 = vmul.f32 %v539_v52, %v539_v52  ;;  %v545_v2 = vmul.f32 %v540_v54, %v540_v54  ;;  %v821_v50 = vld [vmem:[#allocation2 + $0x190] sm:$0xff]  ;;  %v822_v52 = vld [vmem:[#allocation2 + $0x198] sm:$0xff]  ;;  %v816_v33 = vld [vmem:[#allocation2 + $0x168] sm:$0xff] }
 0x231   :  { %v546_v5 = vmul.f32 %v541_v59, %v541_v59  ;;  %v2039_v51 = vpack.c.bf16 %v683_v49, %v682_v48  ;;  %v805_v54 = vld [vmem:[#allocation2 + $0x110] sm:$0xff]  ;;  %2038 = vmatprep.subr.bf16.mxu1 %v2037_v47  ;;  %v688_v47 = vld [vmem:[#allocation2 + $0x40] sm:$0xff]  ;;  %v689_v48 = vld [vmem:[#allocation2 + $0x48] sm:$0xff] }
 0x232   :  { %v547_v63 = vadd.f32 %v543_v58, %v542_v55  ;;  %v806_v55 = vld [vmem:[#allocation2 + $0x118] sm:$0xff]  ;;  %v2069_v58 = vpack.c.bf16 %v822_v52, %v821_v50  ;;  %v827_v49 = vld [vmem:[#allocation2 + $0x1c0] sm:$0xff]  ;;  %v2051_v50 = vpack.c.bf16 %v689_v48, %v688_v47  ;;  %v833_v48 = vld [vmem:[#allocation2 + $0x1f0] sm:$0xff] }
 0x233   :  { %v2071_v59 = vpack.c.bf16 %v806_v55, %v805_v54  ;;  %2040 = vmatpush3.bf16.msra.mxu1 %v2039_v51  ;;  %v828_v51 = vld [vmem:[#allocation2 + $0x1c8] sm:$0xff]  ;;  %v811_v52 = vld [vmem:[#allocation2 + $0x140] sm:$0xff]  ;;  %v695_v47 = vld [vmem:[#allocation2 + $0x78] sm:$0xff] }
 0x234   :  { %v548_v3 = vadd.f32 %v547_v63, %v544_v60  ;;  %v700_v60 = vld [vmem:[#allocation2 + $0xa0] sm:$0xff]  ;;  %v701_v63 = vld [vmem:[#allocation2 + $0xa8] sm:$0xff]  ;;  %v2081_v55 = vpack.c.bf16 %v828_v51, %v827_v49  ;;  %v817_v51 = vld [vmem:[#allocation2 + $0x170] sm:$0xff] }
 0x235   :  { %v812_v54 = vld [vmem:[#allocation2 + $0x148] sm:$0xff] }
 0x236   :  { %v549_v6 = vadd.f32 %v548_v3, %v545_v2  ;;  %v2041_v2 = vpack.c.bf16 %v701_v63, %v700_v60  ;;  %v684_v3 = vld [vmem:[#allocation2 + $0x20] sm:$0xff]  ;;  %v707_v60 = vld [vmem:[#allocation2 + $0xd8] sm:$0xff] }
 0x238   :  { %v550_v7 = vadd.f32 %v549_v6, %v546_v5  ;;  %v685_v5 = vld [vmem:[#allocation2 + $0x28] sm:$0xff]  ;;  %v823_v6 = vld [vmem:[#allocation2 + $0x1a0] sm:$0xff]  ;;  %2042 = vmatprep.subr.bf16.mxu1 %v2041_v2  ;;  %v690_v2 = vld [vmem:[#allocation2 + $0x50] sm:$0xff] }
 0x23a   :  { %v551_v8 = vrot.slane %v550_v7, 4 }
 0x23c   :  { %v552_v9 = vadd.f32 %v551_v8, %v550_v7  ;;  %v2043_v7 = vpack.c.bf16 %v685_v5, %v684_v3  ;;  %v824_v8 = vld [vmem:[#allocation2 + $0x1a8] sm:$0xff]  ;;  %v691_v3 = vld [vmem:[#allocation2 + $0x58] sm:$0xff]  ;;  %v829_v5 = vld [vmem:[#allocation2 + $0x1d0] sm:$0xff] }
 0x23e   :  { %v553_v11 = vrot.slane %v552_v9, 2  ;;  %2044 = vmatpush3.bf16.msra.mxu1 %v2043_v7  ;;  %v830_v7 = vld [vmem:[#allocation2 + $0x1d8] sm:$0xff] }
 0x240   :  { %v554_v13 = vadd.f32 %v553_v11, %v552_v9  ;;  %v807_v9 = vld [vmem:[#allocation2 + $0x120] sm:$0xff]  ;;  %v808_v11 = vld [vmem:[#allocation2 + $0x128] sm:$0xff] }
 0x242   :  { %v555_v16 = vrot.slane %v554_v13, 1 }
 0x244   :  { %v556_v17 = vadd.f32 %v555_v16, %v554_v13  ;;  %v2073_v13 = vpack.c.bf16 %v824_v8, %v823_v6  ;;  %v2075_v16 = vpack.c.bf16 %v808_v11, %v807_v9  ;;  %v2055_v6 = vpack.c.bf16 %v691_v3, %v690_v2  ;;  %v813_v8 = vld [vmem:[#allocation2 + $0x150] sm:$0xff]  ;;  %v814_v9 = vld [vmem:[#allocation2 + $0x158] sm:$0xff] }
 0x245   :  { %v2085_v11 = vpack.c.bf16 %v830_v7, %v829_v5 }
 0x246   :  { %1841 = vmatmul.mubr.f32.vlgmr.msra.gmra.mrb[20].mxu0 %v556_v17  ;;  %v702_v17 = vld [vmem:[#allocation2 + $0xb0] sm:$0xff] }
 0x247   :  { %2068 = vmatpush3.bf16.msra.mxu0 %v2067_v42  ;;  %v2045_v20 = vpack.c.bf16 %v703_v18, %v702_v17  ;;  %v704_v42 = vld [vmem:[#allocation2 + $0xc0] sm:$0xff]  ;;  %v709_v17 = vld [vmem:[#allocation2 + $0xe8] sm:$0xff] }
 0x248   :  { %2070 = vmatprep.subr.bf16.mxu0 %v2069_v58  ;;  %v2049_v45 = vpack.c.bf16 %v705_v44, %v704_v42  ;;  %v2083_v58 = vpack.c.bf16 %v812_v54, %v811_v52  ;;  %v711_v42 = vld [vmem:[#allocation2 + $0xf8] sm:$0xff] }
 0x249   :  { %2046 = vmatprep.subr.bf16.mxu1 %v2045_v20  ;;  %v692_v20 = vld [vmem:[#allocation2 + $0x60] sm:$0xff]  ;;  %v818_v52 = vld [vmem:[#allocation2 + $0x178] sm:$0xff] }
 0x24a   :  { %2048 = vmatpush3.bf16.msra.mxu1 %v2047_v28  ;;  %v2059_v25 = vpack.c.bf16 %v693_v21, %v692_v20  ;;  %v832_v28 = vld [vmem:[#allocation2 + $0x1e8] sm:$0xff] }
 0x24b   :  { %2072 = vmatpush3.bf16.msra.mxu0 %v2071_v59  ;;  %2050 = vmatprep.subr.bf16.mxu1 %v2049_v45  ;;  %v706_v59 = vld [vmem:[#allocation2 + $0xd0] sm:$0xff]  ;;  %v2089_v36 = vpack.c.bf16 %v832_v28, %v831_v23 }
 0x24c   :  { %2074 = vmatprep.subr.bf16.mxu0 %v2073_v13  ;;  %v2053_v63 = vpack.c.bf16 %v707_v60, %v706_v59  ;;  %v2087_v13 = vpack.c.bf16 %v814_v9, %v813_v8  ;;  %v694_v45 = vld [vmem:[#allocation2 + $0x70] sm:$0xff]  ;;  %v943_v59 = vld [vmem:[#allocation2 + $0x288] sm:$0xff]  ;;  %v644_v9 = vsub.s32 1, %v2628_v46 }
 0x24d   :  { %v2063_v49 = vpack.c.bf16 %v695_v47, %v694_v45  ;;  %v945_v45 = vld [vmem:[#allocation2 + $0x298] sm:$0xff] }
 0x24e   :  { %2052 = vmatpush3.bf16.msra.mxu1 %v2051_v50  ;;  %v834_v50 = vld [vmem:[#allocation2 + $0x1f8] sm:$0xff] }
 0x24f   :  { %2076 = vmatpush3.bf16.msra.mxu0 %v2075_v16  ;;  %2054 = vmatprep.subr.bf16.mxu1 %v2053_v63  ;;  %v708_v16 = vld [vmem:[#allocation2 + $0xe0] sm:$0xff]  ;;  %v2093_v54 = vpack.c.bf16 %v834_v50, %v833_v48  ;;  %v928_v50 = vld [vmem:[#allocation2 + $0x210] sm:$0xff] }
 0x250   :  { %2078 = vmatprep.subr.bf16.mxu0 %v2077_v38  ;;  %v2057_v18 = vpack.c.bf16 %v709_v17, %v708_v16  ;;  %v2091_v38 = vpack.c.bf16 %v816_v33, %v815_v29  ;;  %v927_v33 = vld [vmem:[#allocation2 + $0x208] sm:$0xff] }
 0x252   :  { %2056 = vmatpush3.bf16.msra.mxu1 %v2055_v6 }
 0x253   :  { %2080 = vmatpush3.bf16.msra.mxu0 %v2079_v41  ;;  %2058 = vmatprep.subr.bf16.mxu1 %v2057_v18  ;;  %v710_v41 = vld [vmem:[#allocation2 + $0xf0] sm:$0xff]  ;;  %v653_v18 = vsub.s32 2, %v2628_v46 }
 0x254   :  { %2082 = vmatprep.subr.bf16.mxu0 %v2081_v55  ;;  %v2061_v44 = vpack.c.bf16 %v711_v42, %v710_v41  ;;  %v2095_v55 = vpack.c.bf16 %v818_v52, %v817_v51  ;;  %v929_v51 = vld [vmem:[#allocation2 + $0x218] sm:$0xff]  ;;  %v946_v52 = vld [vmem:[#allocation2 + $0x2a0] sm:$0xff] }
 0x256   :  { %2060 = vmatpush3.bf16.msra.mxu1 %v2059_v25 }
 0x257   :  { %2084 = vmatpush3.bf16.msra.mxu0 %v2083_v58  ;;  %2062 = vmatprep.subr.bf16.mxu1 %v2061_v44  ;;  %v942_v58 = vld [vmem:[#allocation2 + $0x280] sm:$0xff] }
 0x258   :  { %2086 = vmatprep.subr.bf16.mxu0 %v2085_v11  ;;  %v2097_v60 = vpack.c.bf16 %v943_v59, %v942_v58  ;;  %v930_v59 = vld [vmem:[#allocation2 + $0x220] sm:$0xff] }
 0x25a   :  { %2064 = vmatpush3.bf16.msra.mxu1 %v2063_v49 }
 0x25b   :  { %2088 = vmatpush3.bf16.msra.mxu0 %v2087_v13  ;;  %2098 = vmatprep.subr.bf16.mxu1 %v2097_v60  ;;  %v931_v60 = vld [vmem:[#allocation2 + $0x228] sm:$0xff] }
 0x25c   :  { %2090 = vmatprep.subr.bf16.mxu0 %v2089_v36 }
 0x25f   :  { %2092 = vmatpush3.bf16.msra.mxu0 %v2091_v38 }
 0x260   :  { %2094 = vmatprep.subr.bf16.mxu0 %v2093_v54  ;;  %v947_v54 = vld [vmem:[#allocation2 + $0x2a8] sm:$0xff] }
 0x261   :  { %v2105_v58 = vpack.c.bf16 %v947_v54, %v946_v52 }
 0x263   :  { %2096 = vmatpush3.bf16.msra.mxu0 %v2095_v55  ;;  %v2103_v55 = vpack.c.bf16 %v929_v51, %v928_v50  ;;  %v2189_v50 = vld [vmem:[%s2934_s6] sm:$0xff]  ;;  %v2190_v51 = vld [vmem:[%s2934_s6 + $0x18] sm:$0xff] }
 0x264   :  { %2129 = vmatprep.subr.bf16.mxu0 %v2220_v0 }
 0x319   :  { %v623_v63 = vpop.f32.mrb[20].mxu0 }
 0x31a   :  { %v627_v2 = vmul.f32 0.001953125, %v623_v63  ;;  %v1842_v3 = vpop.f32.mrb[21].mxu0  ;;  %v948_v63 = vld [vmem:[#allocation2 + $0x2b0] sm:$0xff] }
 0x31c   :  { %v628_v5 = vadd.f32 1e-05, %v627_v2  ;;  %v949_v2 = vld [vmem:[#allocation2 + $0x2b8] sm:$0xff] }
 0x31d   :  { %v2109_v3 = vpack.c.bf16 %v949_v2, %v948_v63 }
 0x31e   :  { %2183 = vrsqrt.f32 %v628_v5  ;;  %v932_v5 = vld [vmem:[#allocation2 + $0x230] sm:$0xff] }
 0x328   :  { %v2184_v6 = vpop.eup %2183 }
 0x329   :  { %v631_v7 = vrot.slane %v2184_v6, 7  ;;  %v933_v6 = vld [vmem:[#allocation2 + $0x238] sm:$0xff] }
 0x32b   :  { %v633_v8 = vmul.f32 %v631_v7, %v2650_v35  ;;  %v950_v7 = vld [vmem:[#allocation2 + $0x2c0] sm:$0xff] }
 0x32d   :  { %v635_v11 = vrot.slane %v633_v8, 1  ;;  %v645_v16 = vrot.slane %v633_v8, %v644_v9  ;;  %v951_v8 = vld [vmem:[#allocation2 + $0x2c8] sm:$0xff] }
 0x32f   :  { %v637_v13 = vmul.f32 %v635_v11, %v2707_v39  ;;  %v646_v21 = vmul.f32 %v645_v16, %v2665_v57  ;;  %v647_v23 = vmul.f32 %v645_v16, %v2658_v53  ;;  %v648_v25 = vmul.f32 %v645_v16, %v2683_v4  ;;  %v926_v39 = vld [vmem:[#allocation2 + $0x200] sm:$0xff] }
 0x330   :  { %v649_v28 = vmul.f32 %v645_v16, %v2694_v14  ;;  %v650_v36 = vmul.f32 %v645_v16, %v2696_v15  ;;  %v2099_v47 = vpack.c.bf16 %v927_v33, %v926_v39  ;;  %v2113_v11 = vpack.c.bf16 %v951_v8, %v950_v7  ;;  %v935_v16 = vld [vmem:[#allocation2 + $0x248] sm:$0xff]  ;;  %v2188_v33 = vld [vmem:[%s2934_s6 + $0x60] sm:$0xff] }
 0x331   :  { %v639_v17 = vrot.slane %v637_v13, 6  ;;  %v934_v13 = vld [vmem:[#allocation2 + $0x240] sm:$0xff]  ;;  %v955_v39 = vld [vmem:[#allocation2 + $0x2e8] sm:$0xff] }
 0x333   :  { %v641_v20 = vsub.f32 %v2650_v35, %v639_v17  ;;  %v944_v35 = vld [vmem:[#allocation2 + $0x290] sm:$0xff] }
 0x334   :  { %v2101_v49 = vpack.c.bf16 %v945_v45, %v944_v35  ;;  %v952_v17 = vld [vmem:[#allocation2 + $0x2d0] sm:$0xff]  ;;  %v957_v35 = vld [vmem:[#allocation2 + $0x2f8] sm:$0xff] }
 0x335   :  { %v654_v29 = vrot.slane %v641_v20, %v653_v18  ;;  %v953_v20 = vld [vmem:[#allocation2 + $0x2d8] sm:$0xff] }
 0x337   :  { %v655_v38 = vadd.f32 %v654_v29, %v646_v21  ;;  %v656_v41 = vadd.f32 %v654_v29, %v647_v23  ;;  %v657_v42 = vadd.f32 %v654_v29, %v648_v25  ;;  %v658_v44 = vadd.f32 %v654_v29, %v649_v28  ;;  %v2791_v21 = vld [vmem:[%s2934_s6 + $0x48] sm:$0xff]  ;;  %v936_v25 = vld [vmem:[#allocation2 + $0x250] sm:$0xff]  ;;  %v937_v28 = vld [vmem:[#allocation2 + $0x258] sm:$0xff] }
 0x338   :  { %v659_v57 = vadd.f32 %v654_v29, %v650_v36  ;;  %v2117_v23 = vpack.c.bf16 %v953_v20, %v952_v17  ;;  %v954_v29 = vld [vmem:[#allocation2 + $0x2e0] sm:$0xff]  ;;  %v2119_v36 = vpack.c.bf16 %v937_v28, %v936_v25 }
 0x339   :  { %v2737_v53 = vmul.f32 %v655_v38, %v2670_v61  ;;  %v2740_v4 = vmul.f32 %v656_v41, %v2663_v56  ;;  %v2743_v14 = vmul.f32 %v657_v42, %v2675_v62  ;;  %v2746_v48 = vmul.f32 %v658_v44, %v2692_v12  ;;  %v938_v41 = vld [vmem:[#allocation2 + $0x260] sm:$0xff]  ;;  %v939_v42 = vld [vmem:[#allocation2 + $0x268] sm:$0xff]  ;;  %v956_v44 = vld [vmem:[#allocation2 + $0x2f0] sm:$0xff] }
 0x33a   :  { %v2749_v15 = vmul.f32 %v659_v57, %v2701_v10  ;;  %v2121_v38 = vpack.c.bf16 %v955_v39, %v954_v29  ;;  %v2123_v45 = vpack.c.bf16 %v939_v42, %v938_v41  ;;  %v2125_v57 = vpack.c.bf16 %v957_v35, %v956_v44 }
 0x33b   :  { %665 = vst [vmem:[%s2934_s6 + $0x8] sm:$0xff] %v2737_v53  ;;  %666 = vst [vmem:[%s2934_s6 + $0x20] sm:$0xff] %v2740_v4  ;;  %776 = vmatprep.mubr.f32.mxu1 %v2737_v53  ;;  %899 = vmatprep.mubr.f32.mxu0 %v2737_v53 }
 0x33c   :  { %667 = vst [vmem:[%s2934_s6 + $0x38] sm:$0xff] %v2743_v14  ;;  %668 = vst [vmem:[%s2934_s6 + $0x50] sm:$0xff] %v2746_v48  ;;  %777 = vmatmul.mubr.f32.vlgmr.msra.gmra.mrb[12].mxu1 %v2331_v24  ;;  %900 = vmatmul.mubr.f32.vlgmr.msra.gmra.mrb[22].mxu0 %v2331_v24  ;;  %v2107_v24 = vpack.c.bf16 %v931_v60, %v930_v59 }
 0x33d   :  { %669 = vst [vmem:[%s2934_s6 + $0x68] sm:$0xff] %v2749_v15  ;;  %2100 = vmatpush3.bf16.msra.mxu1 %v2099_v47  ;;  %781 = vmatprep.mubr.f32.mxu1 %v2740_v4  ;;  %v940_v47 = vld [vmem:[#allocation2 + $0x270] sm:$0xff] }
 0x33e   :  { %904 = vmatprep.mubr.f32.mxu0 %v2740_v4  ;;  %2102 = vmatprep.subr.bf16.mxu1 %v2101_v49 }
 0x33f   :  { %2131 = vmatpush3.bf16.msra.mxu0 %v2540_v19 }
 0x340   :  { %782 = vmatmul.mubr.f32.gmra.mrb[14].mxu1 %v2340_v26  ;;  %905 = vmatmul.mubr.f32.gmra.mrb[24].mxu0 %v2340_v26  ;;  %v2111_v26 = vpack.c.bf16 %v933_v6, %v932_v5 }
 0x341   :  { %2104 = vmatpush3.bf16.msra.mxu1 %v2103_v55  ;;  %786 = vmatprep.mubr.f32.mxu1 %v2743_v14 }
 0x342   :  { %909 = vmatprep.mubr.f32.mxu0 %v2743_v14  ;;  %2106 = vmatprep.subr.bf16.mxu1 %v2105_v58 }
 0x343   :  { %2132 = vmatprep.subr.bf16.mxu0 %v2220_v0 }
 0x344   :  { %787 = vmatmul.mubr.f32.gmra.mrb[16].mxu1 %v2356_v30  ;;  %910 = vmatmul.mubr.f32.gmra.mrb[26].mxu0 %v2356_v30  ;;  %v2115_v30 = vpack.c.bf16 %v935_v16, %v934_v13 }
 0x345   :  { %2108 = vmatpush3.bf16.msra.mxu1 %v2107_v24  ;;  %791 = vmatprep.mubr.f32.mxu1 %v2746_v48 }
 0x346   :  { %914 = vmatprep.mubr.f32.mxu0 %v2746_v48  ;;  %2110 = vmatprep.subr.bf16.mxu1 %v2109_v3 }
 0x347   :  { %2134 = vmatpush3.bf16.msra.mxu0 %v2552_v22 }
 0x348   :  { %792 = vmatmul.mubr.f32.gmra.mrb[18].mxu1 %v2791_v21  ;;  %915 = vmatmul.mubr.f32.gmra.mrb[28].mxu0 %v2791_v21 }
 0x349   :  { %2112 = vmatpush3.bf16.msra.mxu1 %v2111_v26  ;;  %796 = vmatprep.mubr.f32.mxu1 %v2749_v15 }
 0x34a   :  { %919 = vmatprep.mubr.f32.mxu0 %v2749_v15  ;;  %2114 = vmatprep.subr.bf16.mxu1 %v2113_v11 }
 0x34b   :  { %2135 = vmatprep.subr.bf16.mxu0 %v2220_v0 }
 0x34c   :  { %797 = vmatmul.mubr.f32.gmra.mrb[20].mxu1 %v2188_v33  ;;  %920 = vmatmul.mubr.f32.gmra.mrb[30].mxu0 %v2188_v33 }
 0x34d   :  { %2116 = vmatpush3.bf16.msra.mxu1 %v2115_v30  ;;  %1022 = vmatprep.mubr.f32.mxu1 %v2737_v53  ;;  %v941_v53 = vld [vmem:[#allocation2 + $0x278] sm:$0xff] }
 0x34e   :  { %2118 = vmatprep.subr.bf16.mxu1 %v2117_v23  ;;  %2137 = vmatpush3.bf16.msra.mxu0 %v2564_v27  ;;  %v2127_v49 = vpack.c.bf16 %v941_v53, %v940_v47 }
 0x34f   :  { %2138 = vmatprep.subr.bf16.mxu0 %v2220_v0  ;;  %1875 = vmatprep.mubr.msk.f32.mxu0 %vm2221_vm0, %v2222_v1 }
 0x351   :  { %2120 = vmatpush3.bf16.msra.mxu1 %v2119_v36 }
 0x352   :  { %2122 = vmatprep.subr.bf16.mxu1 %v2121_v38  ;;  %2140 = vmatpush3.bf16.msra.mxu0 %v2576_v31 }
 0x353   :  { %2141 = vmatprep.subr.bf16.mxu0 %v2220_v0 }
 0x355   :  { %2124 = vmatpush3.bf16.msra.mxu1 %v2123_v45 }
 0x356   :  { %2126 = vmatprep.subr.bf16.mxu1 %v2125_v57  ;;  %2143 = vmatpush3.bf16.msra.mxu0 %v2588_v34 }
 0x357   :  { %2144 = vmatprep.subr.bf16.mxu0 %v2220_v0 }
 0x359   :  { %2128 = vmatpush3.bf16.msra.mxu1 %v2127_v49 }
 0x35a   :  { %2146 = vmatpush3.bf16.msra.mxu0 %v2600_v37  ;;  %2153 = vmatprep.subr.bf16.mxu1 %v2220_v0 }
 0x35b   :  { %2147 = vmatprep.subr.bf16.mxu0 %v2220_v0 }
 0x35c   :  { %1023 = vmatmul.mubr.f32.vlgmr.msra.gmra.mrb[22].mxu1 %v2189_v50 }
 0x35d   :  { %1027 = vmatprep.mubr.f32.mxu1 %v2740_v4  ;;  %2155 = vmatpush3.bf16.msra.mxu1 %v2540_v19  ;;  %v2191_v19 = vld [vmem:[%s2934_s6 + $0x30] sm:$0xff] }
 0x35e   :  { %2149 = vmatpush3.bf16.msra.mxu0 %v2609_v40  ;;  %2156 = vmatprep.subr.bf16.mxu1 %v2220_v0 }
 0x35f   :  { %2150 = vmatprep.subr.bf16.mxu0 %v2220_v0 }
 0x360   :  { %1028 = vmatmul.mubr.f32.gmra.mrb[24].mxu1 %v2190_v51 }
 0x361   :  { %1032 = vmatprep.mubr.f32.mxu1 %v2743_v14  ;;  %2158 = vmatpush3.bf16.msra.mxu1 %v2552_v22 }
 0x362   :  { %2152 = vmatpush3.bf16.msra.mxu0 %v2621_v43  ;;  %2159 = vmatprep.subr.bf16.mxu1 %v2220_v0 }
 0x364   :  { %1033 = vmatmul.mubr.f32.gmra.mrb[26].mxu1 %v2191_v19 }
 0x365   :  { %1037 = vmatprep.mubr.f32.mxu1 %v2746_v48  ;;  %2161 = vmatpush3.bf16.msra.mxu1 %v2564_v27 }
 0x366   :  { %2162 = vmatprep.subr.bf16.mxu1 %v2220_v0 }
 0x368   :  { %1038 = vmatmul.mubr.f32.gmra.mrb[28].mxu1 %v2791_v21 }
 0x369   :  { %1042 = vmatprep.mubr.f32.mxu1 %v2749_v15  ;;  %2164 = vmatpush3.bf16.msra.mxu1 %v2576_v31 }
 0x36a   :  { %2165 = vmatprep.subr.bf16.mxu1 %v2220_v0 }
 0x36c   :  { %1043 = vmatmul.mubr.f32.gmra.mrb[30].mxu1 %v2188_v33 }
 0x36d   :  { %2167 = vmatpush3.bf16.msra.mxu1 %v2588_v34  ;;  %1910 = vmatprep.mubr.msk.f32.mxu1 %vm2221_vm0, %v2222_v1 }
 0x36e   :  { %2168 = vmatprep.subr.bf16.mxu1 %v2220_v0 }
 0x371   :  { %2170 = vmatpush3.bf16.msra.mxu1 %v2600_v37 }
 0x372   :  { %2171 = vmatprep.subr.bf16.mxu1 %v2220_v0 }
 0x375   :  { %2173 = vmatpush3.bf16.msra.mxu1 %v2609_v40 }
 0x376   :  { %2174 = vmatprep.subr.bf16.mxu1 %v2220_v0 }
 0x379   :  { %2176 = vmatpush3.bf16.msra.mxu1 %v2621_v43 }
 0x40f   :  { %v1489_v22 = vpop.f32.mrb[12].mxu1  ;;  %v1536_v27 = vpop.f32.mrb[22].mxu0 }
 0x410   :  { %v1490_v31 = vpop.f32.mrb[13].mxu1  ;;  %v1537_v4 = vpop.f32.mrb[23].mxu0 }
 0x411   :  { %v1491_v34 = vadd.f32 %v1490_v31, %v1489_v22  ;;  %v1538_v14 = vadd.f32 %v1537_v4, %v1536_v27  ;;  %v2862_v27 = vld [vmem:[%s2931_s3 + $0x4] sm:$0x7] }
 0x413   :  { %v1492_v48 = vpop.f32.mrb[14].mxu1  ;;  %v1539_v1 = vpop.f32.mrb[24].mxu0  ;;  %v1048_v55 = vrot.slane %v1491_v34, 7 }
 0x414   :  { %v1493_v15 = vpop.f32.mrb[15].mxu1  ;;  %v1540_v52 = vpop.f32.mrb[25].mxu0 }
 0x415   :  { %v1494_v54 = vadd.f32 %v1493_v15, %v1492_v48  ;;  %v1541_v37 = vadd.f32 %v1540_v52, %v1539_v1  ;;  %v1083_v48 = vrot.slane %v2862_v27, %v2643_v32 }
 0x417   :  { %v1049_v58 = vrot.slane %v1494_v54, 7  ;;  %v1495_v59 = vpop.f32.mrb[16].mxu1  ;;  %v1542_v40 = vpop.f32.mrb[26].mxu0 }
 0x418   :  { %v1496_v60 = vpop.f32.mrb[17].mxu1  ;;  %v1543_v0 = vpop.f32.mrb[27].mxu0 }
 0x419   :  { %v1056_v43 = vsel %vm400_vm1, %v1048_v55, %v1049_v58  ;;  %v1497_v63 = vadd.f32 %v1496_v60, %v1495_v59  ;;  %v1544_v2 = vadd.f32 %v1543_v0, %v1542_v40 }
 0x41a   :  { %v1059_v24 = vadd.f32 %v1541_v37, %v1056_v43 }
 0x41b   :  { %v1050_v3 = vrot.slane %v1497_v63, 7  ;;  %v1498_v5 = vpop.f32.mrb[18].mxu1  ;;  %v1545_v6 = vpop.f32.mrb[28].mxu0 }
 0x41c   :  { %v1499_v7 = vpop.f32.mrb[19].mxu1  ;;  %v1546_v8 = vpop.f32.mrb[29].mxu0 }
 0x41d   :  { %v1500_v26 = vadd.f32 %v1499_v7, %v1498_v5  ;;  %v1055_v11 = vsel %vm400_vm1, %v1049_v58, %v1050_v3  ;;  %v1547_v13 = vadd.f32 %v1546_v8, %v1545_v6 }
 0x41e   :  { %v1060_v16 = vadd.f32 %v1544_v2, %v1055_v11 }
 0x41f   :  { %v1051_v17 = vrot.slane %v1500_v26, 7  ;;  %v1501_v20 = vpop.f32.mrb[20].mxu1  ;;  %v1548_v21 = vpop.f32.mrb[30].mxu0 }
 0x420   :  { %v1502_v30 = vpop.f32.mrb[21].mxu1  ;;  %v1549_v23 = vpop.f32.mrb[31].mxu0 }
 0x421   :  { %v1503_v25 = vadd.f32 %v1502_v30, %v1501_v20  ;;  %v1054_v28 = vsel %vm400_vm1, %v1050_v3, %v1051_v17  ;;  %v1550_v29 = vadd.f32 %v1549_v23, %v1548_v21 }
 0x422   :  { %v1061_v39 = vadd.f32 %v1547_v13, %v1054_v28 }
 0x423   :  { %v1052_v33 = vrot.slane %v1503_v25, 7 }
 0x425   :  { %v1057_v36 = vsel %vm400_vm1, %v1052_v33, %v1048_v55  ;;  %v1053_v38 = vsel %vm400_vm1, %v1051_v17, %v1052_v33 }
 0x426   :  { %v1058_v41 = vadd.f32 %v1538_v14, %v1057_v36  ;;  %v1062_v42 = vadd.f32 %v1550_v29, %v1053_v38 }
 0x42f   :  { %v1583_v44 = vpop.f32.mrb[22].mxu1 }
 0x430   :  { %v1584_v35 = vpop.f32.mrb[23].mxu1 }
 0x431   :  { %v1585_v45 = vadd.f32 %v1584_v35, %v1583_v44 }
 0x433   :  { %v1586_v57 = vpop.f32.mrb[24].mxu1  ;;  %v1063_v49 = vrot.slane %v1585_v45, 1 }
 0x434   :  { %v1587_v47 = vpop.f32.mrb[25].mxu1 }
 0x435   :  { %v1588_v53 = vadd.f32 %v1587_v47, %v1586_v57 }
 0x437   :  { %v1064_v50 = vrot.slane %v1588_v53, 1  ;;  %v1589_v51 = vpop.f32.mrb[26].mxu1 }
 0x438   :  { %v1590_v19 = vpop.f32.mrb[27].mxu1 }
 0x439   :  { %v1071_v22 = vsel %vm416_vm2, %v1063_v49, %v1064_v50  ;;  %v1591_v31 = vadd.f32 %v1590_v19, %v1589_v51 }
 0x43a   :  { %v1073_v4 = vadd.f32 %v1071_v22, %v1058_v41 }
 0x43b   :  { %v1065_v34 = vrot.slane %v1591_v31, 1  ;;  %v1592_v14 = vpop.f32.mrb[28].mxu1 }
 0x43c   :  { %v1593_v1 = vpop.f32.mrb[29].mxu1  ;;  %v1084_v58 = vadd.f32 %v1083_v48, %v1073_v4 }
 0x43d   :  { %v1070_v15 = vsel %vm416_vm2, %v1064_v50, %v1065_v34  ;;  %v1594_v52 = vadd.f32 %v1593_v1, %v1592_v14 }
 0x43e   :  { %v1074_v54 = vadd.f32 %v1070_v15, %v1059_v24  ;;  %v2872_v3 = vmax.f32 %v1084_v58, 0.0 }
 0x43f   :  { %v1066_v37 = vrot.slane %v1594_v52, 1  ;;  %v1595_v55 = vpop.f32.mrb[30].mxu1 }
 0x440   :  { %v1085_v59 = vadd.f32 %v1083_v48, %v1074_v54  ;;  %v1596_v40 = vpop.f32.mrb[31].mxu1  ;;  %v1094_v13 = vmul.f32 %v2872_v3, %v2670_v61 }
 0x441   :  { %v1069_v60 = vsel %vm416_vm2, %v1065_v34, %v1066_v37  ;;  %v1597_v0 = vadd.f32 %v1596_v40, %v1595_v55 }
 0x442   :  { %v2870_v43 = vmax.f32 %v1085_v59, 0.0  ;;  %v1075_v63 = vadd.f32 %v1069_v60, %v1060_v16 }
 0x443   :  { %v1067_v2 = vrot.slane %v1597_v0, 1 }
 0x444   :  { %v1086_v5 = vadd.f32 %v1083_v48, %v1075_v63  ;;  %v1095_v7 = vmul.f32 %v2870_v43, %v2663_v56 }
 0x445   :  { %v1068_v6 = vsel %vm416_vm2, %v1066_v37, %v1067_v2  ;;  %v1072_v24 = vsel %vm416_vm2, %v1067_v2, %v1063_v49 }
 0x446   :  { %v2880_v8 = vmax.f32 %v1086_v5, 0.0  ;;  %v1076_v26 = vadd.f32 %v1068_v6, %v1061_v39  ;;  %v1077_v11 = vadd.f32 %v1072_v24, %v1062_v42  ;;  %v1099_v21 = vadd.f32 %v1095_v7, %v1094_v13 }
 0x448   :  { %v1096_v16 = vmul.f32 %v2880_v8, %v2675_v62  ;;  %v1087_v17 = vadd.f32 %v1083_v48, %v1076_v26  ;;  %v1088_v20 = vadd.f32 %v1083_v48, %v1077_v11 }
 0x44a   :  { %v1092_v30 = vmax.f32 %v1087_v17, 0.0  ;;  %v1093_v23 = vmax.f32 %v1088_v20, 0.0  ;;  %v1100_v25 = vadd.f32 %v1099_v21, %v1096_v16 }
 0x44c   :  { %v1097_v28 = vmul.f32 %v1092_v30, %v2692_v12  ;;  %v1098_v29 = vmul.f32 %v1093_v23, %v2701_v10 }
 0x44e   :  { %v1101_v33 = vadd.f32 %v1100_v25, %v1097_v28 }
 0x450   :  { %v1102_v36 = vadd.f32 %v1101_v33, %v1098_v29 }
 0x452   :  { %v1103_v39 = vrot.slane %v1102_v36, 4 }
 0x454   :  { %v1104_v38 = vadd.f32 %v1103_v39, %v1102_v36 }
 0x456   :  { %v1105_v41 = vrot.slane %v1104_v38, 2 }
 0x458   :  { %v1106_v42 = vadd.f32 %v1105_v41, %v1104_v38 }
 0x45a   :  { %v1107_v44 = vrot.slane %v1106_v42, 1 }
 0x45c   :  { %v1108_v35 = vadd.f32 %v1107_v44, %v1106_v42 }
 0x45e   :  { %1876 = vmatmul.mubr.f32.vlgmr.msra.gmra.mrb[32].mxu0 %v1108_v35 }
 0x531   :  { %v1175_v45 = vpop.f32.mrb[32].mxu0 }
 0x532   :  { %v1179_v57 = vmul.f32 0.001953125, %v1175_v45  ;;  %v1877_v47 = vpop.f32.mrb[33].mxu0 }
 0x534   :  { %v1183_v53 = vrot.slane %v1179_v57, %v2643_v32 }
 0x536   :  { %v1184_v49 = vsub.f32 %v2872_v3, %v1183_v53  ;;  %v1185_v50 = vsub.f32 %v2870_v43, %v1183_v53  ;;  %v1186_v51 = vsub.f32 %v2880_v8, %v1183_v53  ;;  %v1187_v19 = vsub.f32 %v1092_v30, %v1183_v53 }
 0x537   :  { %v1188_v22 = vsub.f32 %v1093_v23, %v1183_v53 }
 0x538   :  { %v1189_v31 = vmul.f32 %v1184_v49, %v2670_v61  ;;  %v1190_v4 = vmul.f32 %v1185_v50, %v2663_v56  ;;  %v1191_v34 = vmul.f32 %v1186_v51, %v2675_v62  ;;  %v1192_v14 = vmul.f32 %v1187_v19, %v2692_v12 }
 0x539   :  { %v1193_v32 = vmul.f32 %v1188_v22, %v2701_v10 }
 0x53a   :  { %v1194_v48 = vmul.f32 %v1189_v31, %v1189_v31  ;;  %v1195_v1 = vmul.f32 %v1190_v4, %v1190_v4  ;;  %v1196_v15 = vmul.f32 %v1191_v34, %v1191_v34  ;;  %v1197_v54 = vmul.f32 %v1192_v14, %v1192_v14 }
 0x53b   :  { %v1198_v55 = vmul.f32 %v1193_v32, %v1193_v32 }
 0x53c   :  { %v1199_v52 = vadd.f32 %v1195_v1, %v1194_v48 }
 0x53e   :  { %v1200_v37 = vadd.f32 %v1199_v52, %v1196_v15 }
 0x540   :  { %v1201_v58 = vadd.f32 %v1200_v37, %v1197_v54 }
 0x542   :  { %v1202_v59 = vadd.f32 %v1201_v58, %v1198_v55 }
 0x544   :  { %v1203_v40 = vrot.slane %v1202_v59, 4 }
 0x546   :  { %v1204_v60 = vadd.f32 %v1203_v40, %v1202_v59 }
 0x548   :  { %v1205_v0 = vrot.slane %v1204_v60, 2 }
 0x54a   :  { %v1206_v63 = vadd.f32 %v1205_v0, %v1204_v60 }
 0x54c   :  { %v1207_v56 = vrot.slane %v1206_v63, 1 }
 0x54e   :  { %v1208_v2 = vadd.f32 %v1207_v56, %v1206_v63 }
 0x550   :  { %1911 = vmatmul.mubr.f32.vlgmr.msra.gmra.mrb[32].mxu1 %v1208_v2 }
 0x623   :  { %v1275_v5 = vpop.f32.mrb[32].mxu1 }
 0x624   :  { %v1279_v6 = vmul.f32 0.001953125, %v1275_v5  ;;  %v1912_v24 = vpop.f32.mrb[33].mxu1 }
 0x626   :  { %v1280_v7 = vadd.f32 1e-05, %v1279_v6 }
 0x628   :  { %2185 = vrsqrt.f32 %v1280_v7 }
 0x632   :  { %v2186_v26 = vpop.eup %2185 }
 0x633   :  { %v1283_v11 = vrot.slane %v2186_v26, 7 }
 0x635   :  { %v1285_v13 = vmul.f32 %v2862_v27, %v1283_v11 }
 0x637   :  { %v1287_v16 = vrot.slane %v1285_v13, 1  ;;  %v1297_v20 = vrot.slane %v1285_v13, %v644_v9 }
 0x639   :  { %v1289_v17 = vmul.f32 %v1287_v16, %v1179_v57  ;;  %v1298_v28 = vmul.f32 %v1297_v20, %v2872_v3  ;;  %v1299_v29 = vmul.f32 %v1297_v20, %v2870_v43  ;;  %v1300_v33 = vmul.f32 %v1297_v20, %v2880_v8 }
 0x63a   :  { %v1301_v36 = vmul.f32 %v1297_v20, %v1092_v30  ;;  %v1302_v38 = vmul.f32 %v1297_v20, %v1093_v23 }
 0x63b   :  { %v1291_v21 = vrot.slane %v1289_v17, 6 }
 0x63d   :  { %v1293_v25 = vsub.f32 %v2862_v27, %v1291_v21  ;;  %v2192_v27 = vld [vmem:[%s2929_s1 + $0x8] sm:$0xff] }
 0x63f   :  { %v1306_v39 = vrot.slane %v1293_v25, %v653_v18 }
 0x641   :  { %v1307_v41 = vadd.f32 %v1306_v39, %v1298_v28  ;;  %v1308_v42 = vadd.f32 %v1306_v39, %v1299_v29  ;;  %v1309_v44 = vadd.f32 %v1306_v39, %v1300_v33  ;;  %v1310_v35 = vadd.f32 %v1306_v39, %v1301_v36 }
 0x642   :  { %v1311_v45 = vadd.f32 %v1306_v39, %v1302_v38 }
 0x643   :  { %v1312_v9 = vmul.f32 %v1307_v41, %v2670_v61  ;;  %v1313_v3 = vmul.f32 %v2192_v27, %v1308_v42  ;;  %v1314_v43 = vmul.f32 %v1309_v44, %v2675_v62  ;;  %v1315_v8 = vmul.f32 %v1310_v35, %v2692_v12 }
 0x644   :  { %v1316_v46 = vmul.f32 %v1311_v45, %v2701_v10 }
 0x645   :  { %1317 = vst [vmem:[%s2934_s6 + $0x10] sm:$0xff] %v1312_v9  ;;  %1318 = vst [vmem:[%s2934_s6 + $0x28] sm:$0xff] %v1313_v3 }
 0x646   :  { %1319 = vst [vmem:[%s2934_s6 + $0x40] sm:$0xff] %v1314_v43  ;;  %1320 = vst [vmem:[%s2934_s6 + $0x58] sm:$0xff] %v1315_v8 }
 0x647   :  { %1321 = vst [vmem:[%s2934_s6 + $0x70] sm:$0xff] %v1316_v46 }
 0x648   :  { %1326 = vsyncpa [#allocation3], 1 }

</bundles_post_ra>
